<compile_context>
chip_gen: v7x
topology: tpu7x:2x2x1
jax: 0.10.0
libtpu: 0.0.40
codegen_flags: <defaults>
</compile_context>

<pallas_src>
import functools
import math

import jax
import jax.numpy as jnp
from jax.experimental import pallas as pl
from jax.experimental.pallas import tpu as pltpu


# 32 MiB scoped VMEM: >= default on v6e/v7x, raises v5e's 16 MiB default, and always
# well under physical VMEM (64 MiB on v7x). Tiles below are sized so that
# (2 double-buffered inputs + residual/bias + f32 accumulator) stay far below this.
_VMEM_LIMIT_BYTES = 32 * 1024 * 1024


def _pick_tile(dim, target, align):
    """Largest tile <= target that is a multiple of `align` and divides `dim`.

    Falls back to the full dimension (single tile, always layout-legal) when no
    aligned divisor exists (e.g. an unpadded 50257 vocab).
    """
    if dim <= target:
        return dim
    t = (target // align) * align
    while t >= align:
        if dim % t == 0:
            return t
        t -= align
    return dim


# ------------------------- fused linear (matmul) kernel ----------------------


def _linear_kernel(*refs, activation, has_bias, has_ln, has_residual, transpose_w):
    it = iter(refs)
    x_ref = next(it)
    w_ref = next(it)
    b_ref = next(it) if has_bias else None
    g_ref = next(it) if has_ln else None
    beta_ref = next(it) if has_ln else None
    r_ref = next(it) if has_residual else None
    o_ref = next(it)
    acc_ref = next(it)

    k = pl.program_id(2)
    nk = pl.num_programs(2)

    @pl.when(k == 0)
    def _init():
        acc_ref[...] = jnp.zeros_like(acc_ref)

    x = x_ref[...]
    if has_ln:
        # fused pre-layernorm (only legal when K is a single tile; wrapper asserts)
        xf = x.astype(jnp.float32)
        mu = jnp.mean(xf, axis=-1, keepdims=True)
        var = jnp.mean(jnp.square(xf - mu), axis=-1, keepdims=True)
        xf = (xf - mu) * jax.lax.rsqrt(var + 1e-5)  # torch nn.LayerNorm default eps
        x = (xf * g_ref[...] + beta_ref[...]).astype(x_ref.dtype)  # back to bf16 for MXU

    w = w_ref[...]
    if transpose_w:
        # x:(tm,tk) . w:(tn,tk) contracted on dim 1 of w  (LM head: no wte.T copy)
        acc_ref[...] += jax.lax.dot_general(
            x, w, (((1,), (1,)), ((), ())), preferred_element_type=jnp.float32)
    else:
        acc_ref[...] += jnp.dot(x, w, preferred_element_type=jnp.float32)

    @pl.when(k == nk - 1)
    def _finalize():
        acc = acc_ref[...]
        if has_bias:
            acc = acc + b_ref[...].astype(jnp.float32)   # added exactly once
        if activation == "gelu_tanh":
            c = math.sqrt(2.0 / math.pi)
            acc = 0.5 * acc * (1.0 + jnp.tanh(c * (acc + 0.044715 * acc * acc * acc)))
        if has_residual:
            acc = acc + r_ref[...].astype(jnp.float32)   # fused residual add
        o_ref[...] = acc.astype(o_ref.dtype)


def pallas_linear(x, w, bias=None, *, activation="none", residual=None,
                  ln_gamma=None, ln_beta=None, transpose_w=False,
                  out_dtype=None, tm=256, tn=256, tk=512):
    """y = [residual +] act(LN(x) @ w + bias).

    x: (M, K).  w: (K, N), or (N, K) when transpose_w=True (contracted on dim 1).
    """
    M, K = x.shape
    if transpose_w:
        N, Kw = w.shape
    else:
        Kw, N = w.shape
    assert Kw == K
    has_ln = ln_gamma is not None
    if has_ln:
        tk = K  # layernorm needs the full row -> single K step

    tm = _pick_tile(M, tm, 8)
    tn = _pick_tile(N, tn, 128)
    tk = _pick_tile(K, tk, 128)
    if has_ln:
        assert tk == K

    out_dtype = out_dtype or x.dtype
    grid = (M // tm, N // tn, K // tk)

    in_specs = [
        pl.BlockSpec((tm, tk), lambda i, j, k: (i, k)),
        (pl.BlockSpec((tn, tk), lambda i, j, k: (j, k)) if transpose_w
         else pl.BlockSpec((tk, tn), lambda i, j, k: (k, j))),
    ]
    args = [x, w]
    if bias is not None:
        in_specs.append(pl.BlockSpec((1, tn), lambda i, j, k: (0, j)))
        args.append(bias.reshape(1, N))
    if has_ln:
        in_specs.append(pl.BlockSpec((1, K), lambda i, j, k: (0, 0)))
        in_specs.append(pl.BlockSpec((1, K), lambda i, j, k: (0, 0)))
        args.append(ln_gamma.reshape(1, K))
        args.append(ln_beta.reshape(1, K))
    if residual is not None:
        in_specs.append(pl.BlockSpec((tm, tn), lambda i, j, k: (i, j)))
        args.append(residual)

    kernel = functools.partial(
        _linear_kernel, activation=activation, has_bias=bias is not None,
        has_ln=has_ln, has_residual=residual is not None, transpose_w=transpose_w)

    return pl.pallas_call(
        kernel,
        out_shape=jax.ShapeDtypeStruct((M, N), out_dtype),
        grid=grid,
        in_specs=in_specs,
        out_specs=pl.BlockSpec((tm, tn), lambda i, j, k: (i, j)),
        scratch_shapes=[pltpu.VMEM((tm, tn), jnp.float32)],
        compiler_params=pltpu.CompilerParams(
            dimension_semantics=("parallel", "parallel", "arbitrary"),
            vmem_limit_bytes=_VMEM_LIMIT_BYTES),
    )(*args)


# --------------------- flash-style causal self-attention ---------------------


def _flash_attn_kernel(q_ref, k_ref, v_ref, o_ref, m_sc, l_sc, acc_sc, *, scale):
    # q_ref/k_ref/v_ref: (1, t, 1, H, Dh) views into the qkv slab; o_ref: (1, tq, H, Dh)
    kv = pl.program_id(2)
    nkv = pl.num_programs(2)
    tq = q_ref.shape[1]
    tkv = k_ref.shape[1]

    @pl.when(kv == 0)
    def _init():
        m_sc[...] = jnp.full_like(m_sc, -jnp.inf)
        l_sc[...] = jnp.zeros_like(l_sc)
        acc_sc[...] = jnp.zeros_like(acc_sc)

    q_start = pl.program_id(1) * tq
    k_start = kv * tkv

    # Skip KV tiles that are entirely above the causal diagonal (fully masked).
    @pl.when(k_start <= q_start + tq - 1)
    def _compute():
        q = jnp.transpose(q_ref[0, :, 0], (1, 0, 2))   # (H, tq,  Dh)
        k = jnp.transpose(k_ref[0, :, 0], (1, 0, 2))   # (H, tkv, Dh)
        v = jnp.transpose(v_ref[0, :, 0], (1, 0, 2))   # (H, tkv, Dh)

        s = jnp.einsum("hqd,hkd->hqk", q, k,
                       preferred_element_type=jnp.float32) * scale
        row = q_start + jax.lax.broadcasted_iota(jnp.int32, (tq, tkv), 0)
        col = k_start + jax.lax.broadcasted_iota(jnp.int32, (tq, tkv), 1)
        # -inf is safe: kv tile 0 always contains col 0 <= every row, so each row's
        # running max is finite before any fully-masked row/tile combination occurs.
        s = jnp.where((col <= row)[None, :, :], s, -jnp.inf)

        m_prev = m_sc[...]
        m_new = jnp.maximum(m_prev, jnp.max(s, axis=-1, keepdims=True))
        alpha = jnp.exp(m_prev - m_new)
        p = jnp.exp(s - m_new)
        l_sc[...] = alpha * l_sc[...] + jnp.sum(p, axis=-1, keepdims=True)
        acc_sc[...] = alpha * acc_sc[...] + jnp.einsum(
            "hqk,hkd->hqd", p.astype(v.dtype), v, preferred_element_type=jnp.float32)
        m_sc[...] = m_new

    @pl.when(kv == nkv - 1)
    def _finalize():
        out = acc_sc[...] * pl.reciprocal(l_sc[...], approx=True)   # (H, tq, Dh)
        o_ref[0] = jnp.transpose(out, (1, 0, 2)).astype(o_ref.dtype)


def pallas_causal_attention(qkv, *, tq=128, tkv=128):
    """qkv: (B, T, 3, H, Dh) fused projection slab -> attention output (B, T, H, Dh)."""
    B, T, three, H, Dh = qkv.shape
    assert three == 3
    tq = _pick_tile(T, tq, 8)
    tkv = _pick_tile(T, tkv, 8)
    scale = 1.0 / math.sqrt(Dh)

    q_spec = pl.BlockSpec((1, tq, 1, H, Dh), lambda b, qi, kv: (b, qi, 0, 0, 0))
    k_spec = pl.BlockSpec((1, tkv, 1, H, Dh), lambda b, qi, kv: (b, kv, 1, 0, 0))
    v_spec = pl.BlockSpec((1, tkv, 1, H, Dh), lambda b, qi, kv: (b, kv, 2, 0, 0))
    o_spec = pl.BlockSpec((1, tq, H, Dh), lambda b, qi, kv: (b, qi, 0, 0))

    return pl.pallas_call(
        functools.partial(_flash_attn_kernel, scale=scale),
        out_shape=jax.ShapeDtypeStruct((B, T, H, Dh), qkv.dtype),
        grid=(B, T // tq, T // tkv),
        in_specs=[q_spec, k_spec, v_spec],
        out_specs=o_spec,
        scratch_shapes=[
            pltpu.VMEM((H, tq, 1), jnp.float32),    # running max m
            pltpu.VMEM((H, tq, 1), jnp.float32),    # running denom l
            pltpu.VMEM((H, tq, Dh), jnp.float32),   # running numerator acc
        ],
        compiler_params=pltpu.CompilerParams(
            dimension_semantics=("parallel", "parallel", "arbitrary"),
            vmem_limit_bytes=_VMEM_LIMIT_BYTES),
    )(qkv, qkv, qkv)


# --------------------------- parameter construction --------------------------


def init_params(key, *, vocab, block_size, n_layer, n_head, n_embd):
    """Deterministic init mirroring 预生转换器._初始化_权重 (std=0.02, scaled MLP proj).

    Matmul weights / embeddings are stored in bf16 (MXU inputs); biases and
    layernorm affine parameters stay f32.
    """
    keys = iter(jax.random.split(key, 2 + 4 * n_layer))
    std = 0.02
    proj_std = std * (2 * n_layer) ** -0.5   # 小小预生转换器比例差值 scaling (MLP 投影)

    def normal(k, shape, s):
        return (s * jax.random.normal(k, shape, jnp.float32)).astype(jnp.bfloat16)

    params = {
        "wte": normal(next(keys), (vocab, n_embd), std),
        "wpe": normal(next(keys), (block_size, n_embd), std),
        "lnf_g": jnp.ones((n_embd,), jnp.float32),
        "lnf_b": jnp.zeros((n_embd,), jnp.float32),
        "blocks": [],
    }
    for _ in range(n_layer):
        blk = {
            "ln1_g": jnp.ones((n_embd,), jnp.float32),
            "ln1_b": jnp.zeros((n_embd,), jnp.float32),
            "w_qkv": normal(next(keys), (n_embd, 3 * n_embd), std),
            "b_qkv": jnp.zeros((3 * n_embd,), jnp.float32),
            "w_attn_proj": normal(next(keys), (n_embd, n_embd), std),
            "b_attn_proj": jnp.zeros((n_embd,), jnp.float32),
            "ln2_g": jnp.ones((n_embd,), jnp.float32),
            "ln2_b": jnp.zeros((n_embd,), jnp.float32),
            "w_fc": normal(next(keys), (n_embd, 4 * n_embd), std),
            "b_fc": jnp.zeros((4 * n_embd,), jnp.float32),
            "w_mlp_proj": normal(next(keys), (4 * n_embd, n_embd), proj_std),
            "b_mlp_proj": jnp.zeros((n_embd,), jnp.float32),
        }
        params["blocks"].append(blk)
    return params


# -------------------------------- forward pass -------------------------------


def gpt_forward(params, tokens, *, n_head):
    """预生转换器.forward with 目标=None -> (logits, None)."""
    B, T = tokens.shape
    wte, wpe = params["wte"], params["wpe"]
    vocab, C = wte.shape
    H = n_head
    Dh = C // H

    # token + position embedding (gather is glue, kept in plain JAX); bf16 activations
    x = wte[tokens] + wpe[:T][None, :, :]          # (B, T, C)
    x = x.reshape(B * T, C)

    for blk in params["blocks"]:
        # ---- attention sub-block: fused LN1 + QKV projection ----
        qkv = pallas_linear(x, blk["w_qkv"], blk["b_qkv"],
                            ln_gamma=blk["ln1_g"], ln_beta=blk["ln1_b"])   # (B*T, 3C)
        qkv = qkv.reshape(B, T, 3, H, Dh)          # free reshape, no HBM transpose
        y = pallas_causal_attention(qkv)           # (B, T, H, Dh)
        # output projection with fused residual add
        x = pallas_linear(y.reshape(B * T, C), blk["w_attn_proj"],
                          blk["b_attn_proj"], residual=x)

        # ---- MLP sub-block: fused LN2 + FC + tanh-GELU, then proj + residual ----
        h = pallas_linear(x, blk["w_fc"], blk["b_fc"], activation="gelu_tanh",
                          ln_gamma=blk["ln2_g"], ln_beta=blk["ln2_b"])
        x = pallas_linear(h, blk["w_mlp_proj"], blk["b_mlp_proj"], residual=x)

    # fused final layernorm + tied LM head (weight = wte, no bias, no wte.T copy)
    logits = pallas_linear(x, wte, bias=None,
                           ln_gamma=params["lnf_g"], ln_beta=params["lnf_b"],
                           transpose_w=True, out_dtype=jnp.float32)
    logits = logits.reshape(B, T, vocab)

    # TODO(synk): cross-entropy loss branch (目标 is not None) not implemented; forward is called with 目标=None.
    return logits, None


# ------------------------------------ main ------------------------------------


if __name__ == "__main__":
    VOCAB = 128
    BLOCK_SIZE = 16   # 序长
    N_LAYER = 2       # 层数
    N_HEAD = 4        # 头数
    N_EMBD = 32       # 嵌长
    B, T = 2, 8

    key = jax.random.PRNGKey(0)
    pkey, tkey = jax.random.split(key)
    params = init_params(
        pkey, vocab=VOCAB, block_size=BLOCK_SIZE,
        n_layer=N_LAYER, n_head=N_HEAD, n_embd=N_EMBD,
    )
    tokens = jax.random.randint(tkey, (B, T), 0, VOCAB, dtype=jnp.int32)

    fwd = jax.jit(functools.partial(gpt_forward, n_head=N_HEAD))
    logits, loss = fwd(params, tokens)
    logits = jax.block_until_ready(logits)

    assert logits.shape == (B, T, VOCAB)
    assert loss is None
    assert bool(jnp.all(jnp.isfinite(logits)))
    print("KERNEL_OK")
</pallas_src>

<mosaic_0001>
module attributes {stable_mosaic.version = 11 : i64} {
  func.func @_linear_kernel(%arg0: i32, %arg1: i32, %arg2: i32, %arg3: memref<16x32xbf16, #tpu.memory_space<vmem>>, %arg4: memref<32x96xbf16, #tpu.memory_space<vmem>>, %arg5: memref<1x96xf32, #tpu.memory_space<vmem>>, %arg6: memref<1x32xf32, #tpu.memory_space<vmem>>, %arg7: memref<1x32xf32, #tpu.memory_space<vmem>>, %arg8: memref<16x96xbf16, #tpu.memory_space<vmem>>, %arg9: memref<16x96xf32, #tpu.memory_space<vmem>>) attributes {dimension_semantics = [#tpu.dimension_semantics<parallel>, #tpu.dimension_semantics<parallel>, #tpu.dimension_semantics<arbitrary>], iteration_bounds = array<i64: 1, 1, 1>, scalar_prefetch = 0 : i64, scratch_operands = 1 : i64, tpu.core_type = #tpu.core_type<tc>, window_params = [{transform_indices = @transform_0, window_bounds = array<i64: 16, 32>}, {transform_indices = @transform_1, window_bounds = array<i64: 32, 96>}, {transform_indices = @transform_2, window_bounds = array<i64: 1, 96>}, {pipeline_mode = #tpu.pipeline_mode<synchronous>, transform_indices = @transform_3, window_bounds = array<i64: 1, 32>}, {pipeline_mode = #tpu.pipeline_mode<synchronous>, transform_indices = @transform_4, window_bounds = array<i64: 1, 32>}, {transform_indices = @transform_5, window_bounds = array<i64: 16, 96>}]} {
    %c0_i32 = arith.constant 0 : i32
    %0 = arith.cmpi eq, %arg2, %c0_i32 : i32
    %1 = arith.extui %0 : i1 to i32
    %c0_i32_0 = arith.constant 0 : i32
    %2 = arith.cmpi ne, %1, %c0_i32_0 : i32
    scf.if %2 {
      %cst_19 = arith.constant 0.000000e+00 : f32
      %38 = vector.broadcast %cst_19 : f32 to vector<16x96xf32>
      %c0_20 = arith.constant 0 : index
      %c0_21 = arith.constant 0 : index
      %39 = vector.load %arg9[%c0_20, %c0_21] : memref<16x96xf32, #tpu.memory_space<vmem>>, vector<16x96xf32>
      tpu.vector_store %arg9[%c0_20, %c0_21], %38 {strides = array<i32>} : memref<16x96xf32, #tpu.memory_space<vmem>>, vector<16x96xf32>,
    } else {
    }
    %c0 = arith.constant 0 : index
    %c0_1 = arith.constant 0 : index
    %3 = vector.load %arg3[%c0, %c0_1] : memref<16x32xbf16, #tpu.memory_space<vmem>>, vector<16x32xbf16>
    %4 = arith.extf %3 : vector<16x32xbf16> to vector<16x32xf32>
    %cst = arith.constant dense<0.000000e+00> : vector<16xf32>
    %5 = vector.multi_reduction <add>, %4, %cst [1] : vector<16x32xf32> to vector<16xf32>
    %6 = vector.shape_cast %5 : vector<16xf32> to vector<16x1xf32>
    %cst_2 = arith.constant 3.200000e+01 : f32
    %7 = vector.broadcast %cst_2 : f32 to vector<16x1xf32>
    %8 = arith.divf %6, %7 : vector<16x1xf32>
    %9 = vector.broadcast %8 : vector<16x1xf32> to vector<16x32xf32>
    %10 = arith.subf %4, %9 : vector<16x32xf32>
    %11 = arith.mulf %10, %10 : vector<16x32xf32>
    %cst_3 = arith.constant dense<0.000000e+00> : vector<16xf32>
    %12 = vector.multi_reduction <add>, %11, %cst_3 [1] : vector<16x32xf32> to vector<16xf32>
    %13 = vector.shape_cast %12 : vector<16xf32> to vector<16x1xf32>
    %cst_4 = arith.constant 3.200000e+01 : f32
    %14 = vector.broadcast %cst_4 : f32 to vector<16x1xf32>
    %15 = arith.divf %13, %14 : vector<16x1xf32>
    %16 = vector.broadcast %8 : vector<16x1xf32> to vector<16x32xf32>
    %17 = arith.subf %4, %16 : vector<16x32xf32>
    %cst_5 = arith.constant 9.99999974E-6 : f32
    %18 = vector.broadcast %cst_5 : f32 to vector<16x1xf32>
    %19 = arith.addf %15, %18 : vector<16x1xf32>
    %20 = math.rsqrt %19 : vector<16x1xf32>
    %21 = vector.broadcast %20 : vector<16x1xf32> to vector<16x32xf32>
    %22 = arith.mulf %17, %21 : vector<16x32xf32>
    %c0_6 = arith.constant 0 : index
    %c0_7 = arith.constant 0 : index
    %23 = vector.load %arg6[%c0_6, %c0_7] : memref<1x32xf32, #tpu.memory_space<vmem>>, vector<1x32xf32>
    %24 = vector.broadcast %23 : vector<1x32xf32> to vector<16x32xf32>
    %25 = arith.mulf %22, %24 : vector<16x32xf32>
    %c0_8 = arith.constant 0 : index
    %c0_9 = arith.constant 0 : index
    %26 = vector.load %arg7[%c0_8, %c0_9] : memref<1x32xf32, #tpu.memory_space<vmem>>, vector<1x32xf32>
    %27 = vector.broadcast %26 : vector<1x32xf32> to vector<16x32xf32>
    %28 = arith.addf %25, %27 : vector<16x32xf32>
    %29 = arith.truncf %28 : vector<16x32xf32> to vector<16x32xbf16>
    %c0_10 = arith.constant 0 : index
    %c0_11 = arith.constant 0 : index
    %30 = vector.load %arg4[%c0_10, %c0_11] : memref<32x96xbf16, #tpu.memory_space<vmem>>, vector<32x96xbf16>
    %c0_12 = arith.constant 0 : index
    %c0_13 = arith.constant 0 : index
    %31 = vector.load %arg9[%c0_12, %c0_13] : memref<16x96xf32, #tpu.memory_space<vmem>>, vector<16x96xf32>
    %cst_14 = arith.constant dense<0.000000e+00> : vector<16x96xf32>
    %32 = tpu.matmul %29, %30, %cst_14 {dimension_numbers = #tpu.dot_dimension_numbers<[1], [0], [0], [1], [0, 0, 1, 1], [], []>} : vector<16x32xbf16>, vector<32x96xbf16>, vector<16x96xf32> -> vector<16x96xf32>
    %33 = arith.addf %31, %32 : vector<16x96xf32>
    %c0_15 = arith.constant 0 : index
    %c0_16 = arith.constant 0 : index
    %34 = vector.load %arg9[%c0_15, %c0_16] : memref<16x96xf32, #tpu.memory_space<vmem>>, vector<16x96xf32>
    tpu.vector_store %arg9[%c0_15, %c0_16], %33 {strides = array<i32>} : memref<16x96xf32, #tpu.memory_space<vmem>>, vector<16x96xf32>,
    %c0_i32_17 = arith.constant 0 : i32
    %35 = arith.cmpi eq, %arg2, %c0_i32_17 : i32
    %36 = arith.extui %35 : i1 to i32
    %c0_i32_18 = arith.constant 0 : i32
    %37 = arith.cmpi ne, %36, %c0_i32_18 : i32
    scf.if %37 {
      %c0_19 = arith.constant 0 : index
      %c0_20 = arith.constant 0 : index
      %38 = vector.load %arg9[%c0_19, %c0_20] : memref<16x96xf32, #tpu.memory_space<vmem>>, vector<16x96xf32>
      %c0_21 = arith.constant 0 : index
      %c0_22 = arith.constant 0 : index
      %39 = vector.load %arg5[%c0_21, %c0_22] : memref<1x96xf32, #tpu.memory_space<vmem>>, vector<1x96xf32>
      %40 = vector.broadcast %39 : vector<1x96xf32> to vector<16x96xf32>
      %41 = arith.addf %38, %40 : vector<16x96xf32>
      %42 = arith.truncf %41 : vector<16x96xf32> to vector<16x96xbf16>
      %c0_23 = arith.constant 0 : index
      %c0_24 = arith.constant 0 : index
      %43 = vector.load %arg8[%c0_23, %c0_24] : memref<16x96xbf16, #tpu.memory_space<vmem>>, vector<16x96xbf16>
      tpu.vector_store %arg8[%c0_23, %c0_24], %42 {strides = array<i32>} : memref<16x96xbf16, #tpu.memory_space<vmem>>, vector<16x96xbf16>,
    } else {
    }
    return
  }
  func.func @transform_0(%arg0: i32, %arg1: i32, %arg2: i32) -> (i32, i32) {
    %c0_i32 = arith.constant 0 : i32
    return %arg0, %arg2 : i32, i32
  }
  func.func @transform_1(%arg0: i32, %arg1: i32, %arg2: i32) -> (i32, i32) {
    %c0_i32 = arith.constant 0 : i32
    return %arg2, %arg1 : i32, i32
  }
  func.func @transform_2(%arg0: i32, %arg1: i32, %arg2: i32) -> (i32, i32) {
    %c0_i32 = arith.constant 0 : i32
    %c0_i32_0 = arith.constant 0 : i32
    return %c0_i32, %arg1 : i32, i32
  }
  func.func @transform_3(%arg0: i32, %arg1: i32, %arg2: i32) -> (i32, i32) {
    %c0_i32 = arith.constant 0 : i32
    %c0_i32_0 = arith.constant 0 : i32
    %c0_i32_1 = arith.constant 0 : i32
    return %c0_i32, %c0_i32_0 : i32, i32
  }
  func.func @transform_4(%arg0: i32, %arg1: i32, %arg2: i32) -> (i32, i32) {
    %c0_i32 = arith.constant 0 : i32
    %c0_i32_0 = arith.constant 0 : i32
    %c0_i32_1 = arith.constant 0 : i32
    return %c0_i32, %c0_i32_0 : i32, i32
  }
  func.func @transform_5(%arg0: i32, %arg1: i32, %arg2: i32) -> (i32, i32) {
    %c0_i32 = arith.constant 0 : i32
    return %arg0, %arg1 : i32, i32
  }
}

module attributes {stable_mosaic.version = 11 : i64} {
  func.func @_flash_attn_kernel(%arg0: i32, %arg1: i32, %arg2: i32, %arg3: memref<1x8x1x4x8xbf16, #tpu.memory_space<vmem>>, %arg4: memref<1x8x1x4x8xbf16, #tpu.memory_space<vmem>>, %arg5: memref<1x8x1x4x8xbf16, #tpu.memory_space<vmem>>, %arg6: memref<1x8x4x8xbf16, #tpu.memory_space<vmem>>, %arg7: memref<4x8x1xf32, #tpu.memory_space<vmem>>, %arg8: memref<4x8x1xf32, #tpu.memory_space<vmem>>, %arg9: memref<4x8x8xf32, #tpu.memory_space<vmem>>) attributes {dimension_semantics = [#tpu.dimension_semantics<parallel>, #tpu.dimension_semantics<parallel>, #tpu.dimension_semantics<arbitrary>], iteration_bounds = array<i64: 2, 1, 1>, scalar_prefetch = 0 : i64, scratch_operands = 3 : i64, tpu.core_type = #tpu.core_type<tc>, window_params = [{transform_indices = @transform_0, window_bounds = array<i64: 1, 8, 1, 4, 8>}, {transform_indices = @transform_1, window_bounds = array<i64: 1, 8, 1, 4, 8>}, {transform_indices = @transform_2, window_bounds = array<i64: 1, 8, 1, 4, 8>}, {transform_indices = @transform_3, window_bounds = array<i64: 1, 8, 4, 8>}]} {
    %c0_i32 = arith.constant 0 : i32
    %0 = arith.cmpi eq, %arg2, %c0_i32 : i32
    %1 = arith.extui %0 : i1 to i32
    %c0_i32_0 = arith.constant 0 : i32
    %2 = arith.cmpi ne, %1, %c0_i32_0 : i32
    scf.if %2 {
      %cst = arith.constant 0xFF800000 : f32
      %13 = vector.broadcast %cst : f32 to vector<4x8x1xf32>
      %c0 = arith.constant 0 : index
      %c0_6 = arith.constant 0 : index
      %c0_7 = arith.constant 0 : index
      %14 = vector.load %arg7[%c0, %c0_6, %c0_7] : memref<4x8x1xf32, #tpu.memory_space<vmem>>, vector<4x8x1xf32>
      tpu.vector_store %arg7[%c0, %c0_6, %c0_7], %13 {strides = array<i32>} : memref<4x8x1xf32, #tpu.memory_space<vmem>>, vector<4x8x1xf32>,
      %cst_8 = arith.constant 0.000000e+00 : f32
      %15 = vector.broadcast %cst_8 : f32 to vector<4x8x1xf32>
      %c0_9 = arith.constant 0 : index
      %c0_10 = arith.constant 0 : index
      %c0_11 = arith.constant 0 : index
      %16 = vector.load %arg8[%c0_9, %c0_10, %c0_11] : memref<4x8x1xf32, #tpu.memory_space<vmem>>, vector<4x8x1xf32>
      tpu.vector_store %arg8[%c0_9, %c0_10, %c0_11], %15 {strides = array<i32>} : memref<4x8x1xf32, #tpu.memory_space<vmem>>, vector<4x8x1xf32>,
      %cst_12 = arith.constant 0.000000e+00 : f32
      %17 = vector.broadcast %cst_12 : f32 to vector<4x8x8xf32>
      %c0_13 = arith.constant 0 : index
      %c0_14 = arith.constant 0 : index
      %c0_15 = arith.constant 0 : index
      %18 = vector.load %arg9[%c0_13, %c0_14, %c0_15] : memref<4x8x8xf32, #tpu.memory_space<vmem>>, vector<4x8x8xf32>
      tpu.vector_store %arg9[%c0_13, %c0_14, %c0_15], %17 {strides = array<i32>} : memref<4x8x8xf32, #tpu.memory_space<vmem>>, vector<4x8x8xf32>,
    } else {
    }
    %c8_i32 = arith.constant 8 : i32
    %3 = arith.muli %arg1, %c8_i32 : i32
    %c8_i32_1 = arith.constant 8 : i32
    %4 = arith.muli %arg2, %c8_i32_1 : i32
    %c8_i32_2 = arith.constant 8 : i32
    %5 = arith.addi %3, %c8_i32_2 : i32
    %c1_i32 = arith.constant 1 : i32
    %6 = arith.subi %5, %c1_i32 : i32
    %7 = arith.cmpi sle, %4, %6 : i32
    %8 = arith.extui %7 : i1 to i32
    %c0_i32_3 = arith.constant 0 : i32
    %9 = arith.cmpi ne, %8, %c0_i32_3 : i32
    scf.if %9 {
      %c0 = arith.constant 0 : index
      %c0_6 = arith.constant 0 : index
      %c0_7 = arith.constant 0 : index
      %c0_8 = arith.constant 0 : index
      %c0_9 = arith.constant 0 : index
      %13 = vector.load %arg3[%c0, %c0_6, %c0_7, %c0_8, %c0_9] : memref<1x8x1x4x8xbf16, #tpu.memory_space<vmem>>, vector<1x8x1x4x8xbf16>
      %14 = vector.shape_cast %13 : vector<1x8x1x4x8xbf16> to vector<8x4x8xbf16>
      %15 = tpu.transpose %14, [1, 0, 2] : vector<8x4x8xbf16> -> vector<4x8x8xbf16>
      %c0_10 = arith.constant 0 : index
      %c0_11 = arith.constant 0 : index
      %c0_12 = arith.constant 0 : index
      %c0_13 = arith.constant 0 : index
      %c0_14 = arith.constant 0 : index
      %16 = vector.load %arg4[%c0_10, %c0_11, %c0_12, %c0_13, %c0_14] : memref<1x8x1x4x8xbf16, #tpu.memory_space<vmem>>, vector<1x8x1x4x8xbf16>
      %17 = vector.shape_cast %16 : vector<1x8x1x4x8xbf16> to vector<8x4x8xbf16>
      %18 = tpu.transpose %17, [1, 0, 2] : vector<8x4x8xbf16> -> vector<4x8x8xbf16>
      %c0_15 = arith.constant 0 : index
      %c0_16 = arith.constant 0 : index
      %c0_17 = arith.constant 0 : index
      %c0_18 = arith.constant 0 : index
      %c0_19 = arith.constant 0 : index
      %19 = vector.load %arg5[%c0_15, %c0_16, %c0_17, %c0_18, %c0_19] : memref<1x8x1x4x8xbf16, #tpu.memory_space<vmem>>, vector<1x8x1x4x8xbf16>
      %20 = vector.shape_cast %19 : vector<1x8x1x4x8xbf16> to vector<8x4x8xbf16>
      %21 = tpu.transpose %20, [1, 0, 2] : vector<8x4x8xbf16> -> vector<4x8x8xbf16>
      "tpu.trace_start"() <{level = 10 : i32, message = "hqd,hkd->hqk"}> : () -> ()
      %cst = arith.constant dense<0.000000e+00> : vector<4x8x8xf32>
      %22 = tpu.matmul %15, %18, %cst {dimension_numbers = #tpu.dot_dimension_numbers<[2], [2], [1], [1], [0, 0, 0, 1, 1, 1], [0], [0]>} : vector<4x8x8xbf16>, vector<4x8x8xbf16>, vector<4x8x8xf32> -> vector<4x8x8xf32>
      "tpu.trace_stop"() : () -> ()
      %cst_20 = arith.constant 0.353553385 : f32
      %23 = vector.broadcast %cst_20 : f32 to vector<4x8x8xf32>
      %24 = arith.mulf %22, %23 : vector<4x8x8xf32>
      %25 = tpu.iota {dimensions = array<i32: 0>} : vector<8x8xi32>
      %26 = vector.broadcast %3 : i32 to vector<8x8xi32>
      %27 = arith.addi %26, %25 : vector<8x8xi32>
      %28 = tpu.iota {dimensions = array<i32: 1>} : vector<8x8xi32>
      %29 = vector.broadcast %4 : i32 to vector<8x8xi32>
      %30 = arith.addi %29, %28 : vector<8x8xi32>
      %31 = arith.cmpi sle, %30, %27 : vector<8x8xi32>
      %32 = vector.shape_cast %31 : vector<8x8xi1> to vector<1x8x8xi1>
      %cst_21 = arith.constant 0xFF800000 : f32
      %33 = vector.shape_cast %32 : vector<1x8x8xi1> to vector<1x8x8xi1>
      %34 = vector.broadcast %33 : vector<1x8x8xi1> to vector<4x8x8xi1>
      %35 = vector.broadcast %cst_21 : f32 to vector<4x8x8xf32>
      %36 = arith.select %34, %24, %35 : vector<4x8x8xi1>, vector<4x8x8xf32>
      %c0_22 = arith.constant 0 : index
      %c0_23 = arith.constant 0 : index
      %c0_24 = arith.constant 0 : index
      %37 = vector.load %arg7[%c0_22, %c0_23, %c0_24] : memref<4x8x1xf32, #tpu.memory_space<vmem>>, vector<4x8x1xf32>
      %cst_25 = arith.constant dense<0xFF800000> : vector<4x8xf32>
      %38 = vector.multi_reduction <maximumf>, %36, %cst_25 [2] : vector<4x8x8xf32> to vector<4x8xf32>
      %39 = vector.shape_cast %38 : vector<4x8xf32> to vector<4x8x1xf32>
      %40 = arith.maximumf %37, %39 : vector<4x8x1xf32>
      %41 = arith.subf %37, %40 : vector<4x8x1xf32>
      %42 = math.exp %41 : vector<4x8x1xf32>
      %43 = vector.broadcast %40 : vector<4x8x1xf32> to vector<4x8x8xf32>
      %44 = arith.subf %36, %43 : vector<4x8x8xf32>
      %45 = math.exp %44 : vector<4x8x8xf32>
      %c0_26 = arith.constant 0 : index
      %c0_27 = arith.constant 0 : index
      %c0_28 = arith.constant 0 : index
      %46 = vector.load %arg8[%c0_26, %c0_27, %c0_28] : memref<4x8x1xf32, #tpu.memory_space<vmem>>, vector<4x8x1xf32>
      %47 = arith.mulf %42, %46 : vector<4x8x1xf32>
      %cst_29 = arith.constant dense<0.000000e+00> : vector<4x8xf32>
      %48 = vector.multi_reduction <add>, %45, %cst_29 [2] : vector<4x8x8xf32> to vector<4x8xf32>
      %49 = vector.shape_cast %48 : vector<4x8xf32> to vector<4x8x1xf32>
      %50 = arith.addf %47, %49 : vector<4x8x1xf32>
      %c0_30 = arith.constant 0 : index
      %c0_31 = arith.constant 0 : index
      %c0_32 = arith.constant 0 : index
      %51 = vector.load %arg8[%c0_30, %c0_31, %c0_32] : memref<4x8x1xf32, #tpu.memory_space<vmem>>, vector<4x8x1xf32>
      tpu.vector_store %arg8[%c0_30, %c0_31, %c0_32], %50 {strides = array<i32>} : memref<4x8x1xf32, #tpu.memory_space<vmem>>, vector<4x8x1xf32>,
      %c0_33 = arith.constant 0 : index
      %c0_34 = arith.constant 0 : index
      %c0_35 = arith.constant 0 : index
      %52 = vector.load %arg9[%c0_33, %c0_34, %c0_35] : memref<4x8x8xf32, #tpu.memory_space<vmem>>, vector<4x8x8xf32>
      %53 = vector.broadcast %42 : vector<4x8x1xf32> to vector<4x8x8xf32>
      %54 = arith.mulf %53, %52 : vector<4x8x8xf32>
      %55 = arith.truncf %45 : vector<4x8x8xf32> to vector<4x8x8xbf16>
      "tpu.trace_start"() <{level = 10 : i32, message = "hqk,hkd->hqd"}> : () -> ()
      %cst_36 = arith.constant dense<0.000000e+00> : vector<4x8x8xf32>
      %56 = tpu.matmul %55, %21, %cst_36 {dimension_numbers = #tpu.dot_dimension_numbers<[2], [1], [1], [2], [0, 0, 0, 1, 1, 2], [0], [0]>} : vector<4x8x8xbf16>, vector<4x8x8xbf16>, vector<4x8x8xf32> -> vector<4x8x8xf32>
      "tpu.trace_stop"() : () -> ()
      %57 = arith.addf %54, %56 : vector<4x8x8xf32>
      %c0_37 = arith.constant 0 : index
      %c0_38 = arith.constant 0 : index
      %c0_39 = arith.constant 0 : index
      %58 = vector.load %arg9[%c0_37, %c0_38, %c0_39] : memref<4x8x8xf32, #tpu.memory_space<vmem>>, vector<4x8x8xf32>
      tpu.vector_store %arg9[%c0_37, %c0_38, %c0_39], %57 {strides = array<i32>} : memref<4x8x8xf32, #tpu.memory_space<vmem>>, vector<4x8x8xf32>,
      %c0_40 = arith.constant 0 : index
      %c0_41 = arith.constant 0 : index
      %c0_42 = arith.constant 0 : index
      %59 = vector.load %arg7[%c0_40, %c0_41, %c0_42] : memref<4x8x1xf32, #tpu.memory_space<vmem>>, vector<4x8x1xf32>
      tpu.vector_store %arg7[%c0_40, %c0_41, %c0_42], %40 {strides = array<i32>} : memref<4x8x1xf32, #tpu.memory_space<vmem>>, vector<4x8x1xf32>,
    } else {
    }
    %c0_i32_4 = arith.constant 0 : i32
    %10 = arith.cmpi eq, %arg2, %c0_i32_4 : i32
    %11 = arith.extui %10 : i1 to i32
    %c0_i32_5 = arith.constant 0 : i32
    %12 = arith.cmpi ne, %11, %c0_i32_5 : i32
    scf.if %12 {
      %c0 = arith.constant 0 : index
      %c0_6 = arith.constant 0 : index
      %c0_7 = arith.constant 0 : index
      %13 = vector.load %arg9[%c0, %c0_6, %c0_7] : memref<4x8x8xf32, #tpu.memory_space<vmem>>, vector<4x8x8xf32>
      %c0_8 = arith.constant 0 : index
      %c0_9 = arith.constant 0 : index
      %c0_10 = arith.constant 0 : index
      %14 = vector.load %arg8[%c0_8, %c0_9, %c0_10] : memref<4x8x1xf32, #tpu.memory_space<vmem>>, vector<4x8x1xf32>
      %15 = tpu.reciprocal %14 {approx = true} : vector<4x8x1xf32> -> vector<4x8x1xf32>
      %16 = vector.broadcast %15 : vector<4x8x1xf32> to vector<4x8x8xf32>
      %17 = arith.mulf %13, %16 : vector<4x8x8xf32>
      %18 = tpu.transpose %17, [1, 0, 2] : vector<4x8x8xf32> -> vector<8x4x8xf32>
      %19 = arith.truncf %18 : vector<8x4x8xf32> to vector<8x4x8xbf16>
      %c0_11 = arith.constant 0 : index
      %c0_12 = arith.constant 0 : index
      %c0_13 = arith.constant 0 : index
      %c0_14 = arith.constant 0 : index
      %20 = vector.load %arg6[%c0_11, %c0_12, %c0_13, %c0_14] : memref<1x8x4x8xbf16, #tpu.memory_space<vmem>>, vector<1x8x4x8xbf16>
      %21 = vector.shape_cast %20 : vector<1x8x4x8xbf16> to vector<8x4x8xbf16>
      %22 = vector.shape_cast %19 : vector<8x4x8xbf16> to vector<1x8x4x8xbf16>
      tpu.vector_store %arg6[%c0_11, %c0_12, %c0_13, %c0_14], %22 {strides = array<i32>} : memref<1x8x4x8xbf16, #tpu.memory_space<vmem>>, vector<1x8x4x8xbf16>,
    } else {
    }
    return
  }
  func.func @transform_0(%arg0: i32, %arg1: i32, %arg2: i32) -> (i32, i32, i32, i32, i32) {
    %c0_i32 = arith.constant 0 : i32
    %c0_i32_0 = arith.constant 0 : i32
    %c0_i32_1 = arith.constant 0 : i32
    %c0_i32_2 = arith.constant 0 : i32
    return %arg0, %arg1, %c0_i32, %c0_i32_0, %c0_i32_1 : i32, i32, i32, i32, i32
  }
  func.func @transform_1(%arg0: i32, %arg1: i32, %arg2: i32) -> (i32, i32, i32, i32, i32) {
    %c1_i32 = arith.constant 1 : i32
    %c0_i32 = arith.constant 0 : i32
    %c0_i32_0 = arith.constant 0 : i32
    %c0_i32_1 = arith.constant 0 : i32
    return %arg0, %arg2, %c1_i32, %c0_i32, %c0_i32_0 : i32, i32, i32, i32, i32
  }
  func.func @transform_2(%arg0: i32, %arg1: i32, %arg2: i32) -> (i32, i32, i32, i32, i32) {
    %c2_i32 = arith.constant 2 : i32
    %c0_i32 = arith.constant 0 : i32
    %c0_i32_0 = arith.constant 0 : i32
    %c0_i32_1 = arith.constant 0 : i32
    return %arg0, %arg2, %c2_i32, %c0_i32, %c0_i32_0 : i32, i32, i32, i32, i32
  }
  func.func @transform_3(%arg0: i32, %arg1: i32, %arg2: i32) -> (i32, i32, i32, i32) {
    %c0_i32 = arith.constant 0 : i32
    %c0_i32_0 = arith.constant 0 : i32
    %c0_i32_1 = arith.constant 0 : i32
    return %arg0, %arg1, %c0_i32, %c0_i32_0 : i32, i32, i32, i32
  }
}

module attributes {stable_mosaic.version = 11 : i64} {
  func.func @_linear_kernel(%arg0: i32, %arg1: i32, %arg2: i32, %arg3: memref<16x32xbf16, #tpu.memory_space<vmem>>, %arg4: memref<32x32xbf16, #tpu.memory_space<vmem>>, %arg5: memref<1x32xf32, #tpu.memory_space<vmem>>, %arg6: memref<16x32xbf16, #tpu.memory_space<vmem>>, %arg7: memref<16x32xbf16, #tpu.memory_space<vmem>>, %arg8: memref<16x32xf32, #tpu.memory_space<vmem>>) attributes {dimension_semantics = [#tpu.dimension_semantics<parallel>, #tpu.dimension_semantics<parallel>, #tpu.dimension_semantics<arbitrary>], iteration_bounds = array<i64: 1, 1, 1>, scalar_prefetch = 0 : i64, scratch_operands = 1 : i64, tpu.core_type = #tpu.core_type<tc>, window_params = [{transform_indices = @transform_0, window_bounds = array<i64: 16, 32>}, {transform_indices = @transform_1, window_bounds = array<i64: 32, 32>}, {transform_indices = @transform_2, window_bounds = array<i64: 1, 32>}, {transform_indices = @transform_3, window_bounds = array<i64: 16, 32>}, {transform_indices = @transform_4, window_bounds = array<i64: 16, 32>}]} {
    %c0_i32 = arith.constant 0 : i32
    %0 = arith.cmpi eq, %arg2, %c0_i32 : i32
    %1 = arith.extui %0 : i1 to i32
    %c0_i32_0 = arith.constant 0 : i32
    %2 = arith.cmpi ne, %1, %c0_i32_0 : i32
    scf.if %2 {
      %cst_10 = arith.constant 0.000000e+00 : f32
      %12 = vector.broadcast %cst_10 : f32 to vector<16x32xf32>
      %c0_11 = arith.constant 0 : index
      %c0_12 = arith.constant 0 : index
      %13 = vector.load %arg8[%c0_11, %c0_12] : memref<16x32xf32, #tpu.memory_space<vmem>>, vector<16x32xf32>
      tpu.vector_store %arg8[%c0_11, %c0_12], %12 {strides = array<i32>} : memref<16x32xf32, #tpu.memory_space<vmem>>, vector<16x32xf32>,
    } else {
    }
    %c0 = arith.constant 0 : index
    %c0_1 = arith.constant 0 : index
    %3 = vector.load %arg3[%c0, %c0_1] : memref<16x32xbf16, #tpu.memory_space<vmem>>, vector<16x32xbf16>
    %c0_2 = arith.constant 0 : index
    %c0_3 = arith.constant 0 : index
    %4 = vector.load %arg4[%c0_2, %c0_3] : memref<32x32xbf16, #tpu.memory_space<vmem>>, vector<32x32xbf16>
    %c0_4 = arith.constant 0 : index
    %c0_5 = arith.constant 0 : index
    %5 = vector.load %arg8[%c0_4, %c0_5] : memref<16x32xf32, #tpu.memory_space<vmem>>, vector<16x32xf32>
    %cst = arith.constant dense<0.000000e+00> : vector<16x32xf32>
    %6 = tpu.matmul %3, %4, %cst {dimension_numbers = #tpu.dot_dimension_numbers<[1], [0], [0], [1], [0, 0, 1, 1], [], []>} : vector<16x32xbf16>, vector<32x32xbf16>, vector<16x32xf32> -> vector<16x32xf32>
    %7 = arith.addf %5, %6 : vector<16x32xf32>
    %c0_6 = arith.constant 0 : index
    %c0_7 = arith.constant 0 : index
    %8 = vector.load %arg8[%c0_6, %c0_7] : memref<16x32xf32, #tpu.memory_space<vmem>>, vector<16x32xf32>
    tpu.vector_store %arg8[%c0_6, %c0_7], %7 {strides = array<i32>} : memref<16x32xf32, #tpu.memory_space<vmem>>, vector<16x32xf32>,
    %c0_i32_8 = arith.constant 0 : i32
    %9 = arith.cmpi eq, %arg2, %c0_i32_8 : i32
    %10 = arith.extui %9 : i1 to i32
    %c0_i32_9 = arith.constant 0 : i32
    %11 = arith.cmpi ne, %10, %c0_i32_9 : i32
    scf.if %11 {
      %c0_10 = arith.constant 0 : index
      %c0_11 = arith.constant 0 : index
      %12 = vector.load %arg8[%c0_10, %c0_11] : memref<16x32xf32, #tpu.memory_space<vmem>>, vector<16x32xf32>
      %c0_12 = arith.constant 0 : index
      %c0_13 = arith.constant 0 : index
      %13 = vector.load %arg5[%c0_12, %c0_13] : memref<1x32xf32, #tpu.memory_space<vmem>>, vector<1x32xf32>
      %14 = vector.broadcast %13 : vector<1x32xf32> to vector<16x32xf32>
      %15 = arith.addf %12, %14 : vector<16x32xf32>
      %c0_14 = arith.constant 0 : index
      %c0_15 = arith.constant 0 : index
      %16 = vector.load %arg6[%c0_14, %c0_15] : memref<16x32xbf16, #tpu.memory_space<vmem>>, vector<16x32xbf16>
      %17 = arith.extf %16 : vector<16x32xbf16> to vector<16x32xf32>
      %18 = arith.addf %15, %17 : vector<16x32xf32>
      %19 = arith.truncf %18 : vector<16x32xf32> to vector<16x32xbf16>
      %c0_16 = arith.constant 0 : index
      %c0_17 = arith.constant 0 : index
      %20 = vector.load %arg7[%c0_16, %c0_17] : memref<16x32xbf16, #tpu.memory_space<vmem>>, vector<16x32xbf16>
      tpu.vector_store %arg7[%c0_16, %c0_17], %19 {strides = array<i32>} : memref<16x32xbf16, #tpu.memory_space<vmem>>, vector<16x32xbf16>,
    } else {
    }
    return
  }
  func.func @transform_0(%arg0: i32, %arg1: i32, %arg2: i32) -> (i32, i32) {
    %c0_i32 = arith.constant 0 : i32
    return %arg0, %arg2 : i32, i32
  }
  func.func @transform_1(%arg0: i32, %arg1: i32, %arg2: i32) -> (i32, i32) {
    %c0_i32 = arith.constant 0 : i32
    return %arg2, %arg1 : i32, i32
  }
  func.func @transform_2(%arg0: i32, %arg1: i32, %arg2: i32) -> (i32, i32) {
    %c0_i32 = arith.constant 0 : i32
    %c0_i32_0 = arith.constant 0 : i32
    return %c0_i32, %arg1 : i32, i32
  }
  func.func @transform_3(%arg0: i32, %arg1: i32, %arg2: i32) -> (i32, i32) {
    %c0_i32 = arith.constant 0 : i32
    return %arg0, %arg1 : i32, i32
  }
  func.func @transform_4(%arg0: i32, %arg1: i32, %arg2: i32) -> (i32, i32) {
    %c0_i32 = arith.constant 0 : i32
    return %arg0, %arg1 : i32, i32
  }
}

module attributes {stable_mosaic.version = 11 : i64} {
  func.func @_linear_kernel(%arg0: i32, %arg1: i32, %arg2: i32, %arg3: memref<16x32xbf16, #tpu.memory_space<vmem>>, %arg4: memref<32x128xbf16, #tpu.memory_space<vmem>>, %arg5: memref<1x128xf32, #tpu.memory_space<vmem>>, %arg6: memref<1x32xf32, #tpu.memory_space<vmem>>, %arg7: memref<1x32xf32, #tpu.memory_space<vmem>>, %arg8: memref<16x128xbf16, #tpu.memory_space<vmem>>, %arg9: memref<16x128xf32, #tpu.memory_space<vmem>>) attributes {dimension_semantics = [#tpu.dimension_semantics<parallel>, #tpu.dimension_semantics<parallel>, #tpu.dimension_semantics<arbitrary>], iteration_bounds = array<i64: 1, 1, 1>, scalar_prefetch = 0 : i64, scratch_operands = 1 : i64, tpu.core_type = #tpu.core_type<tc>, window_params = [{transform_indices = @transform_0, window_bounds = array<i64: 16, 32>}, {transform_indices = @transform_1, window_bounds = array<i64: 32, 128>}, {transform_indices = @transform_2, window_bounds = array<i64: 1, 128>}, {pipeline_mode = #tpu.pipeline_mode<synchronous>, transform_indices = @transform_3, window_bounds = array<i64: 1, 32>}, {pipeline_mode = #tpu.pipeline_mode<synchronous>, transform_indices = @transform_4, window_bounds = array<i64: 1, 32>}, {transform_indices = @transform_5, window_bounds = array<i64: 16, 128>}]} {
    %c0_i32 = arith.constant 0 : i32
    %0 = arith.cmpi eq, %arg2, %c0_i32 : i32
    %1 = arith.extui %0 : i1 to i32
    %c0_i32_0 = arith.constant 0 : i32
    %2 = arith.cmpi ne, %1, %c0_i32_0 : i32
    scf.if %2 {
      %cst_19 = arith.constant 0.000000e+00 : f32
      %38 = vector.broadcast %cst_19 : f32 to vector<16x128xf32>
      %c0_20 = arith.constant 0 : index
      %c0_21 = arith.constant 0 : index
      %39 = vector.load %arg9[%c0_20, %c0_21] : memref<16x128xf32, #tpu.memory_space<vmem>>, vector<16x128xf32>
      tpu.vector_store %arg9[%c0_20, %c0_21], %38 {strides = array<i32>} : memref<16x128xf32, #tpu.memory_space<vmem>>, vector<16x128xf32>,
    } else {
    }
    %c0 = arith.constant 0 : index
    %c0_1 = arith.constant 0 : index
    %3 = vector.load %arg3[%c0, %c0_1] : memref<16x32xbf16, #tpu.memory_space<vmem>>, vector<16x32xbf16>
    %4 = arith.extf %3 : vector<16x32xbf16> to vector<16x32xf32>
    %cst = arith.constant dense<0.000000e+00> : vector<16xf32>
    %5 = vector.multi_reduction <add>, %4, %cst [1] : vector<16x32xf32> to vector<16xf32>
    %6 = vector.shape_cast %5 : vector<16xf32> to vector<16x1xf32>
    %cst_2 = arith.constant 3.200000e+01 : f32
    %7 = vector.broadcast %cst_2 : f32 to vector<16x1xf32>
    %8 = arith.divf %6, %7 : vector<16x1xf32>
    %9 = vector.broadcast %8 : vector<16x1xf32> to vector<16x32xf32>
    %10 = arith.subf %4, %9 : vector<16x32xf32>
    %11 = arith.mulf %10, %10 : vector<16x32xf32>
    %cst_3 = arith.constant dense<0.000000e+00> : vector<16xf32>
    %12 = vector.multi_reduction <add>, %11, %cst_3 [1] : vector<16x32xf32> to vector<16xf32>
    %13 = vector.shape_cast %12 : vector<16xf32> to vector<16x1xf32>
    %cst_4 = arith.constant 3.200000e+01 : f32
    %14 = vector.broadcast %cst_4 : f32 to vector<16x1xf32>
    %15 = arith.divf %13, %14 : vector<16x1xf32>
    %16 = vector.broadcast %8 : vector<16x1xf32> to vector<16x32xf32>
    %17 = arith.subf %4, %16 : vector<16x32xf32>
    %cst_5 = arith.constant 9.99999974E-6 : f32
    %18 = vector.broadcast %cst_5 : f32 to vector<16x1xf32>
    %19 = arith.addf %15, %18 : vector<16x1xf32>
    %20 = math.rsqrt %19 : vector<16x1xf32>
    %21 = vector.broadcast %20 : vector<16x1xf32> to vector<16x32xf32>
    %22 = arith.mulf %17, %21 : vector<16x32xf32>
    %c0_6 = arith.constant 0 : index
    %c0_7 = arith.constant 0 : index
    %23 = vector.load %arg6[%c0_6, %c0_7] : memref<1x32xf32, #tpu.memory_space<vmem>>, vector<1x32xf32>
    %24 = vector.broadcast %23 : vector<1x32xf32> to vector<16x32xf32>
    %25 = arith.mulf %22, %24 : vector<16x32xf32>
    %c0_8 = arith.constant 0 : index
    %c0_9 = arith.constant 0 : index
    %26 = vector.load %arg7[%c0_8, %c0_9] : memref<1x32xf32, #tpu.memory_space<vmem>>, vector<1x32xf32>
    %27 = vector.broadcast %26 : vector<1x32xf32> to vector<16x32xf32>
    %28 = arith.addf %25, %27 : vector<16x32xf32>
    %29 = arith.truncf %28 : vector<16x32xf32> to vector<16x32xbf16>
    %c0_10 = arith.constant 0 : index
    %c0_11 = arith.constant 0 : index
    %30 = vector.load %arg4[%c0_10, %c0_11] : memref<32x128xbf16, #tpu.memory_space<vmem>>, vector<32x128xbf16>
    %c0_12 = arith.constant 0 : index
    %c0_13 = arith.constant 0 : index
    %31 = vector.load %arg9[%c0_12, %c0_13] : memref<16x128xf32, #tpu.memory_space<vmem>>, vector<16x128xf32>
    %cst_14 = arith.constant dense<0.000000e+00> : vector<16x128xf32>
    %32 = tpu.matmul %29, %30, %cst_14 {dimension_numbers = #tpu.dot_dimension_numbers<[1], [0], [0], [1], [0, 0, 1, 1], [], []>} : vector<16x32xbf16>, vector<32x128xbf16>, vector<16x128xf32> -> vector<16x128xf32>
    %33 = arith.addf %31, %32 : vector<16x128xf32>
    %c0_15 = arith.constant 0 : index
    %c0_16 = arith.constant 0 : index
    %34 = vector.load %arg9[%c0_15, %c0_16] : memref<16x128xf32, #tpu.memory_space<vmem>>, vector<16x128xf32>
    tpu.vector_store %arg9[%c0_15, %c0_16], %33 {strides = array<i32>} : memref<16x128xf32, #tpu.memory_space<vmem>>, vector<16x128xf32>,
    %c0_i32_17 = arith.constant 0 : i32
    %35 = arith.cmpi eq, %arg2, %c0_i32_17 : i32
    %36 = arith.extui %35 : i1 to i32
    %c0_i32_18 = arith.constant 0 : i32
    %37 = arith.cmpi ne, %36, %c0_i32_18 : i32
    scf.if %37 {
      %c0_19 = arith.constant 0 : index
      %c0_20 = arith.constant 0 : index
      %38 = vector.load %arg9[%c0_19, %c0_20] : memref<16x128xf32, #tpu.memory_space<vmem>>, vector<16x128xf32>
      %c0_21 = arith.constant 0 : index
      %c0_22 = arith.constant 0 : index
      %39 = vector.load %arg5[%c0_21, %c0_22] : memref<1x128xf32, #tpu.memory_space<vmem>>, vector<1x128xf32>
      %40 = vector.broadcast %39 : vector<1x128xf32> to vector<16x128xf32>
      %41 = arith.addf %38, %40 : vector<16x128xf32>
      %cst_23 = arith.constant 5.000000e-01 : f32
      %42 = vector.broadcast %cst_23 : f32 to vector<16x128xf32>
      %43 = arith.mulf %42, %41 : vector<16x128xf32>
      %cst_24 = arith.constant 4.471500e-02 : f32
      %44 = vector.broadcast %cst_24 : f32 to vector<16x128xf32>
      %45 = arith.mulf %44, %41 : vector<16x128xf32>
      %46 = arith.mulf %45, %41 : vector<16x128xf32>
      %47 = arith.mulf %46, %41 : vector<16x128xf32>
      %48 = arith.addf %41, %47 : vector<16x128xf32>
      %cst_25 = arith.constant 0.797884583 : f32
      %49 = vector.broadcast %cst_25 : f32 to vector<16x128xf32>
      %50 = arith.mulf %49, %48 : vector<16x128xf32>
      %51 = math.tanh %50 : vector<16x128xf32>
      %cst_26 = arith.constant 1.000000e+00 : f32
      %52 = vector.broadcast %cst_26 : f32 to vector<16x128xf32>
      %53 = arith.addf %52, %51 : vector<16x128xf32>
      %54 = arith.mulf %43, %53 : vector<16x128xf32>
      %55 = arith.truncf %54 : vector<16x128xf32> to vector<16x128xbf16>
      %c0_27 = arith.constant 0 : index
      %c0_28 = arith.constant 0 : index
      %56 = vector.load %arg8[%c0_27, %c0_28] : memref<16x128xbf16, #tpu.memory_space<vmem>>, vector<16x128xbf16>
      tpu.vector_store %arg8[%c0_27, %c0_28], %55 {strides = array<i32>} : memref<16x128xbf16, #tpu.memory_space<vmem>>, vector<16x128xbf16>,
    } else {
    }
    return
  }
  func.func @transform_0(%arg0: i32, %arg1: i32, %arg2: i32) -> (i32, i32) {
    %c0_i32 = arith.constant 0 : i32
    return %arg0, %arg2 : i32, i32
  }
  func.func @transform_1(%arg0: i32, %arg1: i32, %arg2: i32) -> (i32, i32) {
    %c0_i32 = arith.constant 0 : i32
    return %arg2, %arg1 : i32, i32
  }
  func.func @transform_2(%arg0: i32, %arg1: i32, %arg2: i32) -> (i32, i32) {
    %c0_i32 = arith.constant 0 : i32
    %c0_i32_0 = arith.constant 0 : i32
    return %c0_i32, %arg1 : i32, i32
  }
  func.func @transform_3(%arg0: i32, %arg1: i32, %arg2: i32) -> (i32, i32) {
    %c0_i32 = arith.constant 0 : i32
    %c0_i32_0 = arith.constant 0 : i32
    %c0_i32_1 = arith.constant 0 : i32
    return %c0_i32, %c0_i32_0 : i32, i32
  }
  func.func @transform_4(%arg0: i32, %arg1: i32, %arg2: i32) -> (i32, i32) {
    %c0_i32 = arith.constant 0 : i32
    %c0_i32_0 = arith.constant 0 : i32
    %c0_i32_1 = arith.constant 0 : i32
    return %c0_i32, %c0_i32_0 : i32, i32
  }
  func.func @transform_5(%arg0: i32, %arg1: i32, %arg2: i32) -> (i32, i32) {
    %c0_i32 = arith.constant 0 : i32
    return %arg0, %arg1 : i32, i32
  }
}

module attributes {stable_mosaic.version = 11 : i64} {
  func.func @_linear_kernel(%arg0: i32, %arg1: i32, %arg2: i32, %arg3: memref<16x32xbf16, #tpu.memory_space<vmem>>, %arg4: memref<128x32xbf16, #tpu.memory_space<vmem>>, %arg5: memref<1x32xf32, #tpu.memory_space<vmem>>, %arg6: memref<1x32xf32, #tpu.memory_space<vmem>>, %arg7: memref<16x128xf32, #tpu.memory_space<vmem>>, %arg8: memref<16x128xf32, #tpu.memory_space<vmem>>) attributes {dimension_semantics = [#tpu.dimension_semantics<parallel>, #tpu.dimension_semantics<parallel>, #tpu.dimension_semantics<arbitrary>], iteration_bounds = array<i64: 1, 1, 1>, scalar_prefetch = 0 : i64, scratch_operands = 1 : i64, tpu.core_type = #tpu.core_type<tc>, window_params = [{transform_indices = @transform_0, window_bounds = array<i64: 16, 32>}, {transform_indices = @transform_1, window_bounds = array<i64: 128, 32>}, {pipeline_mode = #tpu.pipeline_mode<synchronous>, transform_indices = @transform_2, window_bounds = array<i64: 1, 32>}, {pipeline_mode = #tpu.pipeline_mode<synchronous>, transform_indices = @transform_3, window_bounds = array<i64: 1, 32>}, {transform_indices = @transform_4, window_bounds = array<i64: 16, 128>}]} {
    %c0_i32 = arith.constant 0 : i32
    %0 = arith.cmpi eq, %arg2, %c0_i32 : i32
    %1 = arith.extui %0 : i1 to i32
    %c0_i32_0 = arith.constant 0 : i32
    %2 = arith.cmpi ne, %1, %c0_i32_0 : i32
    scf.if %2 {
      %cst_19 = arith.constant 0.000000e+00 : f32
      %38 = vector.broadcast %cst_19 : f32 to vector<16x128xf32>
      %c0_20 = arith.constant 0 : index
      %c0_21 = arith.constant 0 : index
      %39 = vector.load %arg8[%c0_20, %c0_21] : memref<16x128xf32, #tpu.memory_space<vmem>>, vector<16x128xf32>
      tpu.vector_store %arg8[%c0_20, %c0_21], %38 {strides = array<i32>} : memref<16x128xf32, #tpu.memory_space<vmem>>, vector<16x128xf32>,
    } else {
    }
    %c0 = arith.constant 0 : index
    %c0_1 = arith.constant 0 : index
    %3 = vector.load %arg3[%c0, %c0_1] : memref<16x32xbf16, #tpu.memory_space<vmem>>, vector<16x32xbf16>
    %4 = arith.extf %3 : vector<16x32xbf16> to vector<16x32xf32>
    %cst = arith.constant dense<0.000000e+00> : vector<16xf32>
    %5 = vector.multi_reduction <add>, %4, %cst [1] : vector<16x32xf32> to vector<16xf32>
    %6 = vector.shape_cast %5 : vector<16xf32> to vector<16x1xf32>
    %cst_2 = arith.constant 3.200000e+01 : f32
    %7 = vector.broadcast %cst_2 : f32 to vector<16x1xf32>
    %8 = arith.divf %6, %7 : vector<16x1xf32>
    %9 = vector.broadcast %8 : vector<16x1xf32> to vector<16x32xf32>
    %10 = arith.subf %4, %9 : vector<16x32xf32>
    %11 = arith.mulf %10, %10 : vector<16x32xf32>
    %cst_3 = arith.constant dense<0.000000e+00> : vector<16xf32>
    %12 = vector.multi_reduction <add>, %11, %cst_3 [1] : vector<16x32xf32> to vector<16xf32>
    %13 = vector.shape_cast %12 : vector<16xf32> to vector<16x1xf32>
    %cst_4 = arith.constant 3.200000e+01 : f32
    %14 = vector.broadcast %cst_4 : f32 to vector<16x1xf32>
    %15 = arith.divf %13, %14 : vector<16x1xf32>
    %16 = vector.broadcast %8 : vector<16x1xf32> to vector<16x32xf32>
    %17 = arith.subf %4, %16 : vector<16x32xf32>
    %cst_5 = arith.constant 9.99999974E-6 : f32
    %18 = vector.broadcast %cst_5 : f32 to vector<16x1xf32>
    %19 = arith.addf %15, %18 : vector<16x1xf32>
    %20 = math.rsqrt %19 : vector<16x1xf32>
    %21 = vector.broadcast %20 : vector<16x1xf32> to vector<16x32xf32>
    %22 = arith.mulf %17, %21 : vector<16x32xf32>
    %c0_6 = arith.constant 0 : index
    %c0_7 = arith.constant 0 : index
    %23 = vector.load %arg5[%c0_6, %c0_7] : memref<1x32xf32, #tpu.memory_space<vmem>>, vector<1x32xf32>
    %24 = vector.broadcast %23 : vector<1x32xf32> to vector<16x32xf32>
    %25 = arith.mulf %22, %24 : vector<16x32xf32>
    %c0_8 = arith.constant 0 : index
    %c0_9 = arith.constant 0 : index
    %26 = vector.load %arg6[%c0_8, %c0_9] : memref<1x32xf32, #tpu.memory_space<vmem>>, vector<1x32xf32>
    %27 = vector.broadcast %26 : vector<1x32xf32> to vector<16x32xf32>
    %28 = arith.addf %25, %27 : vector<16x32xf32>
    %29 = arith.truncf %28 : vector<16x32xf32> to vector<16x32xbf16>
    %c0_10 = arith.constant 0 : index
    %c0_11 = arith.constant 0 : index
    %30 = vector.load %arg4[%c0_10, %c0_11] : memref<128x32xbf16, #tpu.memory_space<vmem>>, vector<128x32xbf16>
    %c0_12 = arith.constant 0 : index
    %c0_13 = arith.constant 0 : index
    %31 = vector.load %arg8[%c0_12, %c0_13] : memref<16x128xf32, #tpu.memory_space<vmem>>, vector<16x128xf32>
    %cst_14 = arith.constant dense<0.000000e+00> : vector<16x128xf32>
    %32 = tpu.matmul %29, %30, %cst_14 {dimension_numbers = #tpu.dot_dimension_numbers<[1], [1], [0], [0], [0, 0, 1, 0], [], []>} : vector<16x32xbf16>, vector<128x32xbf16>, vector<16x128xf32> -> vector<16x128xf32>
    %33 = arith.addf %31, %32 : vector<16x128xf32>
    %c0_15 = arith.constant 0 : index
    %c0_16 = arith.constant 0 : index
    %34 = vector.load %arg8[%c0_15, %c0_16] : memref<16x128xf32, #tpu.memory_space<vmem>>, vector<16x128xf32>
    tpu.vector_store %arg8[%c0_15, %c0_16], %33 {strides = array<i32>} : memref<16x128xf32, #tpu.memory_space<vmem>>, vector<16x128xf32>,
    %c0_i32_17 = arith.constant 0 : i32
    %35 = arith.cmpi eq, %arg2, %c0_i32_17 : i32
    %36 = arith.extui %35 : i1 to i32
    %c0_i32_18 = arith.constant 0 : i32
    %37 = arith.cmpi ne, %36, %c0_i32_18 : i32
    scf.if %37 {
      %c0_19 = arith.constant 0 : index
      %c0_20 = arith.constant 0 : index
      %38 = vector.load %arg8[%c0_19, %c0_20] : memref<16x128xf32, #tpu.memory_space<vmem>>, vector<16x128xf32>
      %c0_21 = arith.constant 0 : index
      %c0_22 = arith.constant 0 : index
      %39 = vector.load %arg7[%c0_21, %c0_22] : memref<16x128xf32, #tpu.memory_space<vmem>>, vector<16x128xf32>
      tpu.vector_store %arg7[%c0_21, %c0_22], %38 {strides = array<i32>} : memref<16x128xf32, #tpu.memory_space<vmem>>, vector<16x128xf32>,
    } else {
    }
    return
  }
  func.func @transform_0(%arg0: i32, %arg1: i32, %arg2: i32) -> (i32, i32) {
    %c0_i32 = arith.constant 0 : i32
    return %arg0, %arg2 : i32, i32
  }
  func.func @transform_1(%arg0: i32, %arg1: i32, %arg2: i32) -> (i32, i32) {
    %c0_i32 = arith.constant 0 : i32
    return %arg1, %arg2 : i32, i32
  }
  func.func @transform_2(%arg0: i32, %arg1: i32, %arg2: i32) -> (i32, i32) {
    %c0_i32 = arith.constant 0 : i32
    %c0_i32_0 = arith.constant 0 : i32
    %c0_i32_1 = arith.constant 0 : i32
    return %c0_i32, %c0_i32_0 : i32, i32
  }
  func.func @transform_3(%arg0: i32, %arg1: i32, %arg2: i32) -> (i32, i32) {
    %c0_i32 = arith.constant 0 : i32
    %c0_i32_0 = arith.constant 0 : i32
    %c0_i32_1 = arith.constant 0 : i32
    return %c0_i32, %c0_i32_0 : i32, i32
  }
  func.func @transform_4(%arg0: i32, %arg1: i32, %arg2: i32) -> (i32, i32) {
    %c0_i32 = arith.constant 0 : i32
    return %arg0, %arg1 : i32, i32
  }
}

module attributes {stable_mosaic.version = 11 : i64} {
  func.func @_linear_kernel(%arg0: i32, %arg1: i32, %arg2: i32, %arg3: memref<16x128xbf16, #tpu.memory_space<vmem>>, %arg4: memref<128x32xbf16, #tpu.memory_space<vmem>>, %arg5: memref<1x32xf32, #tpu.memory_space<vmem>>, %arg6: memref<16x32xbf16, #tpu.memory_space<vmem>>, %arg7: memref<16x32xbf16, #tpu.memory_space<vmem>>, %arg8: memref<16x32xf32, #tpu.memory_space<vmem>>) attributes {dimension_semantics = [#tpu.dimension_semantics<parallel>, #tpu.dimension_semantics<parallel>, #tpu.dimension_semantics<arbitrary>], iteration_bounds = array<i64: 1, 1, 1>, scalar_prefetch = 0 : i64, scratch_operands = 1 : i64, tpu.core_type = #tpu.core_type<tc>, window_params = [{transform_indices = @transform_0, window_bounds = array<i64: 16, 128>}, {transform_indices = @transform_1, window_bounds = array<i64: 128, 32>}, {transform_indices = @transform_2, window_bounds = array<i64: 1, 32>}, {transform_indices = @transform_3, window_bounds = array<i64: 16, 32>}, {transform_indices = @transform_4, window_bounds = array<i64: 16, 32>}]} {
    %c0_i32 = arith.constant 0 : i32
    %0 = arith.cmpi eq, %arg2, %c0_i32 : i32
    %1 = arith.extui %0 : i1 to i32
    %c0_i32_0 = arith.constant 0 : i32
    %2 = arith.cmpi ne, %1, %c0_i32_0 : i32
    scf.if %2 {
      %cst_10 = arith.constant 0.000000e+00 : f32
      %12 = vector.broadcast %cst_10 : f32 to vector<16x32xf32>
      %c0_11 = arith.constant 0 : index
      %c0_12 = arith.constant 0 : index
      %13 = vector.load %arg8[%c0_11, %c0_12] : memref<16x32xf32, #tpu.memory_space<vmem>>, vector<16x32xf32>
      tpu.vector_store %arg8[%c0_11, %c0_12], %12 {strides = array<i32>} : memref<16x32xf32, #tpu.memory_space<vmem>>, vector<16x32xf32>,
    } else {
    }
    %c0 = arith.constant 0 : index
    %c0_1 = arith.constant 0 : index
    %3 = vector.load %arg3[%c0, %c0_1] : memref<16x128xbf16, #tpu.memory_space<vmem>>, vector<16x128xbf16>
    %c0_2 = arith.constant 0 : index
    %c0_3 = arith.constant 0 : index
    %4 = vector.load %arg4[%c0_2, %c0_3] : memref<128x32xbf16, #tpu.memory_space<vmem>>, vector<128x32xbf16>
    %c0_4 = arith.constant 0 : index
    %c0_5 = arith.constant 0 : index
    %5 = vector.load %arg8[%c0_4, %c0_5] : memref<16x32xf32, #tpu.memory_space<vmem>>, vector<16x32xf32>
    %cst = arith.constant dense<0.000000e+00> : vector<16x32xf32>
    %6 = tpu.matmul %3, %4, %cst {dimension_numbers = #tpu.dot_dimension_numbers<[1], [0], [0], [1], [0, 0, 1, 1], [], []>} : vector<16x128xbf16>, vector<128x32xbf16>, vector<16x32xf32> -> vector<16x32xf32>
    %7 = arith.addf %5, %6 : vector<16x32xf32>
    %c0_6 = arith.constant 0 : index
    %c0_7 = arith.constant 0 : index
    %8 = vector.load %arg8[%c0_6, %c0_7] : memref<16x32xf32, #tpu.memory_space<vmem>>, vector<16x32xf32>
    tpu.vector_store %arg8[%c0_6, %c0_7], %7 {strides = array<i32>} : memref<16x32xf32, #tpu.memory_space<vmem>>, vector<16x32xf32>,
    %c0_i32_8 = arith.constant 0 : i32
    %9 = arith.cmpi eq, %arg2, %c0_i32_8 : i32
    %10 = arith.extui %9 : i1 to i32
    %c0_i32_9 = arith.constant 0 : i32
    %11 = arith.cmpi ne, %10, %c0_i32_9 : i32
    scf.if %11 {
      %c0_10 = arith.constant 0 : index
      %c0_11 = arith.constant 0 : index
      %12 = vector.load %arg8[%c0_10, %c0_11] : memref<16x32xf32, #tpu.memory_space<vmem>>, vector<16x32xf32>
      %c0_12 = arith.constant 0 : index
      %c0_13 = arith.constant 0 : index
      %13 = vector.load %arg5[%c0_12, %c0_13] : memref<1x32xf32, #tpu.memory_space<vmem>>, vector<1x32xf32>
      %14 = vector.broadcast %13 : vector<1x32xf32> to vector<16x32xf32>
      %15 = arith.addf %12, %14 : vector<16x32xf32>
      %c0_14 = arith.constant 0 : index
      %c0_15 = arith.constant 0 : index
      %16 = vector.load %arg6[%c0_14, %c0_15] : memref<16x32xbf16, #tpu.memory_space<vmem>>, vector<16x32xbf16>
      %17 = arith.extf %16 : vector<16x32xbf16> to vector<16x32xf32>
      %18 = arith.addf %15, %17 : vector<16x32xf32>
      %19 = arith.truncf %18 : vector<16x32xf32> to vector<16x32xbf16>
      %c0_16 = arith.constant 0 : index
      %c0_17 = arith.constant 0 : index
      %20 = vector.load %arg7[%c0_16, %c0_17] : memref<16x32xbf16, #tpu.memory_space<vmem>>, vector<16x32xbf16>
      tpu.vector_store %arg7[%c0_16, %c0_17], %19 {strides = array<i32>} : memref<16x32xbf16, #tpu.memory_space<vmem>>, vector<16x32xbf16>,
    } else {
    }
    return
  }
  func.func @transform_0(%arg0: i32, %arg1: i32, %arg2: i32) -> (i32, i32) {
    %c0_i32 = arith.constant 0 : i32
    return %arg0, %arg2 : i32, i32
  }
  func.func @transform_1(%arg0: i32, %arg1: i32, %arg2: i32) -> (i32, i32) {
    %c0_i32 = arith.constant 0 : i32
    return %arg2, %arg1 : i32, i32
  }
  func.func @transform_2(%arg0: i32, %arg1: i32, %arg2: i32) -> (i32, i32) {
    %c0_i32 = arith.constant 0 : i32
    %c0_i32_0 = arith.constant 0 : i32
    return %c0_i32, %arg1 : i32, i32
  }
  func.func @transform_3(%arg0: i32, %arg1: i32, %arg2: i32) -> (i32, i32) {
    %c0_i32 = arith.constant 0 : i32
    return %arg0, %arg1 : i32, i32
  }
  func.func @transform_4(%arg0: i32, %arg1: i32, %arg2: i32) -> (i32, i32) {
    %c0_i32 = arith.constant 0 : i32
    return %arg0, %arg1 : i32, i32
  }
}

</mosaic_0001>

<bundles_post_ra>
// kernel: gpt_forward.14
= control target key start
LH: loop header
LB: loop body
LE: loop exit
PB: predicated region body
PF: predicated region fallthrough
CT: control target
= control target key end

     0   :  { %vm31_vm0 = vcmask 261120   ;;  %v232_v16 = vmov 0.0   ;;  %vm233_vm1 = vmmov 0   ;;  %s290_s0 = inlined_call_operand.vmem [shape: bf16[16,32], index: 0, kind: input, shape index: {}]   ;;  %s291_s1 = inlined_call_operand.vmem [shape: bf16[32,128], index: 1, kind: input, shape index: {}]   ;;  %s292_s3 = inlined_call_operand.vmem [shape: f32[1,32], index: 3, kind: input, shape index: {}]   ;;  %s293_s4 = inlined_call_operand.vmem [shape: f32[1,32], index: 4, kind: input, shape index: {}]   ;;  %s294_s2 = inlined_call_operand.vmem [shape: f32[1,128], index: 2, kind: input, shape index: {}]   ;;  %s295_s5 = inlined_call_operand.vmem [shape: bf16[16,128], index: 5, kind: output, shape index: {}]  }
   0x1   :  { %v201_v0 = vld [vmem:[%s290_s0] sm:$0xff]   ;;  %212 = vmatprep.subr.bf16.mxu0 %v232_v16  ;;  %v223_v17 = vld [vmem:[%s291_s1 + $0x8] sm:$0xff]   ;;  %216 = vmatprep.mubr.msk.bf16.mxu0 %vm233_vm1, %v232_v16 }
   0x2   :  { %v202_v1 = vunpack.c.l.bf16 %v201_v0  ;;  %v203_v2 = vunpack.c.h.bf16 %v201_v0  ;;  %v222_v15 = vld [vmem:[%s291_s1] sm:$0xff]  }
   0x3   :  { %213 = vmatpush3.bf16.msra.mxu0 %v222_v15  ;;  %v190_v26 = vld [vmem:[%s292_s3] ss:$0 sm:$0xff] }
   0x4   :  { %v32_v3 = vsel %vm31_vm0, %v202_v1, 0.0  ;;  %v35_v4 = vsel %vm31_vm0, %v203_v2, 0.0  ;;  %214 = vmatprep.subr.bf16.mxu0 %v232_v16  ;;  %v191_v30 = vld [vmem:[%s293_s4] ss:$0 sm:$0xff] }
   0x5   :  { %33 = vadd.xlane.f32.xlu0 %v32_v3  ;;  %v195_v35 = vld [vmem:[%s294_s2] ss:$0 sm:$0xff] }
   0x7   :  { %215 = vmatpush3.bf16.msra.mxu0 %v223_v17 }
   0x9   :  { %36 = vadd.xlane.f32.xlu0 %v35_v4 }
  0x92   :  { %v34_v5 = vpop.xlane.xlu0 %33 }
  0x93   :  { %v39_v6 = vmul.f32 0.03125, %v34_v5 }
  0x95   :  { %v41_v7 = vsub.f32 %v202_v1, %v39_v6 }
  0x96   :  { %v37_v8 = vpop.xlane.xlu0 %36 }
  0x97   :  { %v40_v9 = vmul.f32 0.03125, %v37_v8  ;;  %v43_v10 = vmul.f32 %v41_v7, %v41_v7 }
  0x99   :  { %v42_v11 = vsub.f32 %v203_v2, %v40_v9  ;;  %v45_v12 = vsel %vm31_vm0, %v43_v10, 0.0 }
  0x9a   :  { %46 = vadd.xlane.f32.xlu1 %v45_v12 }
  0x9b   :  { %v44_v13 = vmul.f32 %v42_v11, %v42_v11 }
  0x9d   :  { %v48_v14 = vsel %vm31_vm0, %v44_v13, 0.0 }
  0x9e   :  { %49 = vadd.xlane.f32.xlu1 %v48_v14 }
 0x127   :  { %v47_v18 = vpop.xlane.xlu1 %46 }
 0x128   :  { %v51_v19 = vmul.f32 0.03125, %v47_v18 }
 0x12a   :  { %v53_v20 = vadd.f32 1e-05, %v51_v19 }
 0x12b   :  { %v50_v21 = vpop.xlane.xlu1 %49 }
 0x12c   :  { %224 = vrsqrt.f32 %v53_v20  ;;  %v52_v22 = vmul.f32 0.03125, %v50_v21 }
 0x12e   :  { %v54_v23 = vadd.f32 1e-05, %v52_v22 }
 0x130   :  { %226 = vrsqrt.f32 %v54_v23 }
 0x136   :  { %v225_v24 = vpop.eup %224 }
 0x137   :  { %v57_v25 = vmul.f32 %v225_v24, %v41_v7 }
 0x139   :  { %v66_v29 = vmul.f32 %v190_v26, %v57_v25 }
 0x13a   :  { %v227_v27 = vpop.eup %226 }
 0x13b   :  { %v58_v28 = vmul.f32 %v227_v27, %v42_v11  ;;  %v75_v32 = vadd.f32 %v191_v30, %v66_v29 }
 0x13d   :  { %v67_v31 = vmul.f32 %v190_v26, %v58_v28 }
 0x13f   :  { %v76_v33 = vadd.f32 %v191_v30, %v67_v31 }
 0x141   :  { %v77_v34 = vpack.c.bf16 %v76_v33, %v75_v32 }
 0x143   :  { %217 = vmatmul.mubr.msk.bf16.vlgmr.msra.gmra.mrb[0].mxu0 %vm31_vm0, %v77_v34 }
 0x216   :  { %v133_v36 = vpop.f32.mrb[0].mxu0 }
 0x217   :  { %v156_v37 = vadd.f32 %v195_v35, %v133_v36  ;;  %v218_v38 = vpop.f32.mrb[1].mxu0 }
 0x218   :  { %v136_v39 = vpop.f32.mrb[2].mxu0 }
 0x219   :  { %v160_v40 = vmul.f32 0.044715, %v156_v37  ;;  %v157_v41 = vadd.f32 %v195_v35, %v136_v39  ;;  %v219_v42 = vpop.f32.mrb[3].mxu0  ;;  %v158_v55 = vmul.f32 0.5, %v156_v37 }
 0x21b   :  { %v162_v43 = vmul.f32 %v160_v40, %v156_v37  ;;  %v161_v44 = vmul.f32 0.044715, %v157_v41  ;;  %v159_v56 = vmul.f32 0.5, %v157_v41 }
 0x21d   :  { %v164_v45 = vmul.f32 %v162_v43, %v156_v37  ;;  %v163_v46 = vmul.f32 %v161_v44, %v157_v41 }
 0x21f   :  { %v166_v47 = vadd.f32 %v164_v45, %v156_v37  ;;  %v165_v48 = vmul.f32 %v163_v46, %v157_v41 }
 0x221   :  { %v168_v49 = vmul.f32 0.7978846, %v166_v47  ;;  %v167_v50 = vadd.f32 %v165_v48, %v157_v41 }
 0x223   :  { %228 = vtanh.f32 %v168_v49  ;;  %v169_v51 = vmul.f32 0.7978846, %v167_v50 }
 0x225   :  { %230 = vtanh.f32 %v169_v51 }
 0x22d   :  { %v229_v52 = vpop.eup %228 }
 0x22e   :  { %v172_v53 = vadd.f32 1.0, %v229_v52 }
 0x22f   :  { %v231_v54 = vpop.eup %230 }
 0x230   :  { %v173_v57 = vadd.f32 1.0, %v231_v54  ;;  %v174_v58 = vmul.f32 %v172_v53, %v158_v55 }
 0x232   :  { %v175_v59 = vmul.f32 %v173_v57, %v159_v56 }
 0x234   :  { %v207_v60 = vpack.c.bf16 %v175_v59, %v174_v58 }
 0x236   :  { %208 = vst [vmem:[%s295_s5] sm:$0xff] %v207_v60  }

// kernel: gpt_forward.13
= control target key start
LH: loop header
LB: loop body
LE: loop exit
PB: predicated region body
PF: predicated region fallthrough
CT: control target
= control target key end

     0   :  { %vm22_vm0 = vcmask 261120   ;;  %v163_v0 = vmov 0.0   ;;  %vm164_vm1 = vmmov 0   ;;  %vm127_vm2 = vcmask 257024   ;;  %s216_s1 = inlined_call_operand.vmem [shape: bf16[32,32], index: 1, kind: input, shape index: {}]   ;;  %s217_s0 = inlined_call_operand.vmem [shape: bf16[16,32], index: 0, kind: input, shape index: {}]   ;;  %s218_s3 = inlined_call_operand.vmem [shape: bf16[16,32], index: 3, kind: input, shape index: {}]   ;;  %s219_s2 = inlined_call_operand.vmem [shape: f32[1,32], index: 2, kind: input, shape index: {}]   ;;  %s220_s4 = inlined_call_operand.vmem [shape: bf16[16,32], index: 4, kind: output, shape index: {}]  }
   0x1   :  { %150 = vmatprep.subr.bf16.mxu0 %v163_v0  ;;  %v160_v1 = vld [vmem:[%s216_s1] sm:$0xff]   ;;  %154 = vmatprep.mubr.msk.bf16.mxu0 %vm164_vm1, %v163_v0  ;;  %23 = vst.msk [vmem:[#allocation2] sm:$0xff] %vm22_vm0, %v163_v0  ;;  %24 = vst.msk [vmem:[#allocation2 + $0x8] sm:$0xff] %vm22_vm0, %v163_v0  ;;  %v161_v2 = vld [vmem:[%s216_s1 + $0x8] sm:$0xff]  }
   0x2   :  { %151 = vmatpush3.bf16.msra.mxu0 %v160_v1  ;;  %v162_v3 = vld [vmem:[%s217_s0] sm:$0xff]  }
   0x3   :  { %152 = vmatprep.subr.bf16.mxu0 %v163_v0  ;;  %v144_v12 = vld [vmem:[%s218_s3] sm:$0xff]  }
   0x4   :  { %v138_v13 = vld [vmem:[%s219_s2] ss:$0 sm:$0xff]  ;;  %v145_v14 = vunpack.c.l.bf16 %v144_v12  ;;  %v146_v17 = vunpack.c.h.bf16 %v144_v12 }
   0x6   :  { %153 = vmatpush3.bf16.msra.mxu0 %v161_v2 }
   0x8   :  { %v31_v4 = vld [vmem:[#allocation2] sm:$0xff]  ;;  %v32_v6 = vld [vmem:[#allocation2 + $0x8] sm:$0xff] }
   0x9   :  { %155 = vmatmul.mubr.msk.bf16.vlgmr.msra.gmra.mrb[0].mxu0 %vm22_vm0, %v162_v3 }
  0xdc   :  { %v88_v5 = vpop.f32.mrb[0].mxu0 }
  0xdd   :  { %v95_v7 = vadd.f32 %v88_v5, %v31_v4  ;;  %v156_v8 = vpop.f32.mrb[1].mxu0 }
  0xde   :  { %v91_v9 = vpop.f32.mrb[2].mxu0 }
  0xdf   :  { %97 = vst.msk [vmem:[#allocation2] sm:$0xff] %vm22_vm0, %v95_v7  ;;  %v96_v10 = vadd.f32 %v91_v9, %v32_v6  ;;  %v157_v11 = vpop.f32.mrb[3].mxu0 }
  0xe1   :  { %98 = vst.msk [vmem:[#allocation2 + $0x8] sm:$0xff] %vm22_vm0, %v96_v10 }
  0xe6   :  { %v102_v15 = vld [vmem:[#allocation2] sm:$0xff] }
  0xe7   :  { %v111_v16 = vadd.f32 %v138_v13, %v102_v15 }
  0xe8   :  { %v103_v18 = vld [vmem:[#allocation2 + $0x8] sm:$0xff] }
  0xe9   :  { %v117_v19 = vadd.f32 %v145_v14, %v111_v16  ;;  %v112_v20 = vadd.f32 %v138_v13, %v103_v18 }
  0xeb   :  { %v141_v21 = vpack.c.bf16 %v117_v19, %v117_v19  ;;  %v118_v22 = vadd.f32 %v146_v17, %v112_v20 }
  0xed   :  { %128 = vst.msk [vmem:[%s220_s4] sm:$0xf] %vm127_vm2, %v141_v21  ;;  %v142_v23 = vpack.c.bf16 %v118_v22, %v118_v22 }
  0xef   :  { %129 = vst.msk [vmem:[%s220_s4 + $0x4] sm:$0xf] %vm127_vm2, %v142_v23 }

// kernel: gpt_forward.11
= control target key start
LH: loop header
LB: loop body
LE: loop exit
PB: predicated region body
PF: predicated region fallthrough
CT: control target
= control target key end

     0   :  { %vm32_vm0 = vcmask 261120   ;;  %v208_v16 = vmov 0.0   ;;  %vm209_vm1 = vmmov 0   ;;  %vm25_vm2 = vcmask 785408   ;;  %s273_s0 = inlined_call_operand.vmem [shape: bf16[16,32], index: 0, kind: input, shape index: {}]   ;;  %s274_s1 = inlined_call_operand.vmem [shape: bf16[32,96], index: 1, kind: input, shape index: {}]   ;;  %s275_s3 = inlined_call_operand.vmem [shape: f32[1,32], index: 3, kind: input, shape index: {}]   ;;  %s276_s4 = inlined_call_operand.vmem [shape: f32[1,32], index: 4, kind: input, shape index: {}]   ;;  %s277_s2 = inlined_call_operand.vmem [shape: f32[1,96], index: 2, kind: input, shape index: {}]   ;;  %s278_s5 = inlined_call_operand.vmem [shape: bf16[16,96], index: 5, kind: output, shape index: {}]  }
   0x1   :  { %v186_v0 = vld [vmem:[%s273_s0] sm:$0xff]   ;;  %192 = vmatprep.subr.bf16.mxu0 %v208_v16  ;;  %v203_v17 = vld [vmem:[%s274_s1 + $0x8] sm:$0xff]   ;;  %196 = vmatprep.mubr.msk.bf16.mxu0 %vm209_vm1, %v208_v16  ;;  %26 = vst.msk [vmem:[#allocation2] sm:$0xff] %vm25_vm2, %v208_v16  ;;  %27 = vst.msk [vmem:[#allocation2 + $0x8] sm:$0xff] %vm25_vm2, %v208_v16  ;;  %vm168_vm3 = vcmask 781312  }
   0x2   :  { %v187_v1 = vunpack.c.l.bf16 %v186_v0  ;;  %v188_v2 = vunpack.c.h.bf16 %v186_v0  ;;  %v202_v15 = vld [vmem:[%s274_s1] sm:$0xff]  }
   0x3   :  { %193 = vmatpush3.bf16.msra.mxu0 %v202_v15  ;;  %v175_v26 = vld [vmem:[%s275_s3] ss:$0 sm:$0xff] }
   0x4   :  { %v33_v3 = vsel %vm32_vm0, %v187_v1, 0.0  ;;  %v36_v4 = vsel %vm32_vm0, %v188_v2, 0.0  ;;  %194 = vmatprep.subr.bf16.mxu0 %v208_v16  ;;  %v176_v30 = vld [vmem:[%s276_s4] ss:$0 sm:$0xff] }
   0x5   :  { %34 = vadd.xlane.f32.xlu0 %v33_v3  ;;  %v180_v43 = vld [vmem:[%s277_s2] ss:$0 sm:$0xff] }
   0x7   :  { %195 = vmatpush3.bf16.msra.mxu0 %v203_v17 }
   0x8   :  { %v83_v35 = vld [vmem:[#allocation2] sm:$0xff]  ;;  %v84_v37 = vld [vmem:[#allocation2 + $0x8] sm:$0xff] }
   0x9   :  { %37 = vadd.xlane.f32.xlu0 %v36_v4 }
  0x92   :  { %v35_v5 = vpop.xlane.xlu0 %34 }
  0x93   :  { %v40_v6 = vmul.f32 0.03125, %v35_v5 }
  0x95   :  { %v42_v7 = vsub.f32 %v187_v1, %v40_v6 }
  0x96   :  { %v38_v8 = vpop.xlane.xlu0 %37 }
  0x97   :  { %v41_v9 = vmul.f32 0.03125, %v38_v8  ;;  %v44_v10 = vmul.f32 %v42_v7, %v42_v7 }
  0x99   :  { %v43_v11 = vsub.f32 %v188_v2, %v41_v9  ;;  %v46_v12 = vsel %vm32_vm0, %v44_v10, 0.0 }
  0x9a   :  { %47 = vadd.xlane.f32.xlu1 %v46_v12 }
  0x9b   :  { %v45_v13 = vmul.f32 %v43_v11, %v43_v11 }
  0x9d   :  { %v49_v14 = vsel %vm32_vm0, %v45_v13, 0.0 }
  0x9e   :  { %50 = vadd.xlane.f32.xlu1 %v49_v14 }
 0x127   :  { %v48_v18 = vpop.xlane.xlu1 %47 }
 0x128   :  { %v52_v19 = vmul.f32 0.03125, %v48_v18 }
 0x12a   :  { %v54_v20 = vadd.f32 1e-05, %v52_v19 }
 0x12b   :  { %v51_v21 = vpop.xlane.xlu1 %50 }
 0x12c   :  { %204 = vrsqrt.f32 %v54_v20  ;;  %v53_v22 = vmul.f32 0.03125, %v51_v21 }
 0x12e   :  { %v55_v23 = vadd.f32 1e-05, %v53_v22 }
 0x130   :  { %206 = vrsqrt.f32 %v55_v23 }
 0x136   :  { %v205_v24 = vpop.eup %204 }
 0x137   :  { %v58_v25 = vmul.f32 %v205_v24, %v42_v7 }
 0x139   :  { %v67_v29 = vmul.f32 %v175_v26, %v58_v25 }
 0x13a   :  { %v207_v27 = vpop.eup %206 }
 0x13b   :  { %v59_v28 = vmul.f32 %v207_v27, %v43_v11  ;;  %v76_v32 = vadd.f32 %v176_v30, %v67_v29 }
 0x13d   :  { %v68_v31 = vmul.f32 %v175_v26, %v59_v28 }
 0x13f   :  { %v77_v33 = vadd.f32 %v176_v30, %v68_v31 }
 0x141   :  { %v78_v34 = vpack.c.bf16 %v77_v33, %v76_v32 }
 0x143   :  { %197 = vmatmul.mubr.msk.bf16.vlgmr.msra.gmra.mrb[0].mxu0 %vm32_vm0, %v78_v34 }
 0x216   :  { %v134_v36 = vpop.f32.mrb[0].mxu0 }
 0x217   :  { %v141_v38 = vadd.f32 %v134_v36, %v83_v35  ;;  %v198_v39 = vpop.f32.mrb[1].mxu0 }
 0x218   :  { %v137_v40 = vpop.f32.mrb[2].mxu0 }
 0x219   :  { %144 = vst.msk [vmem:[#allocation2] sm:$0xff] %vm25_vm2, %v141_v38  ;;  %v142_v41 = vadd.f32 %v137_v40, %v84_v37  ;;  %v199_v42 = vpop.f32.mrb[3].mxu0 }
 0x21b   :  { %145 = vst.msk [vmem:[#allocation2 + $0x8] sm:$0xff] %vm25_vm2, %v142_v41 }
 0x220   :  { %v149_v44 = vld [vmem:[#allocation2] sm:$0xff] }
 0x221   :  { %v158_v45 = vadd.f32 %v180_v43, %v149_v44 }
 0x222   :  { %v150_v46 = vld [vmem:[#allocation2 + $0x8] sm:$0xff] }
 0x223   :  { %v183_v47 = vpack.c.bf16 %v158_v45, %v158_v45  ;;  %v159_v48 = vadd.f32 %v180_v43, %v150_v46 }
 0x225   :  { %169 = vst.msk [vmem:[%s278_s5] sm:$0xf] %vm168_vm3, %v183_v47  ;;  %v184_v49 = vpack.c.bf16 %v159_v48, %v159_v48 }
 0x227   :  { %170 = vst.msk [vmem:[%s278_s5 + $0x4] sm:$0xf] %vm168_vm3, %v184_v49 }

// kernel: gpt_forward.12
= control target key start
LH: loop header
LB: loop body
LE: loop exit
PB: predicated region body
PF: predicated region fallthrough
CT: control target
= control target key end

     0   :  { %s1854_s12 = smov 0   ;;  %s1856_s13 = smov 0   ;;  %s2154_s0 = inlined_call_operand.vmem [shape: bf16[2,8,3,4,8], index: 0, kind: input, shape index: {}, may-alias: {0,1,2}]   ;;  %s2155_s1 = inlined_call_operand.vmem [shape: bf16[2,8,3,4,8], index: 1, kind: input, shape index: {}, may-alias: {0,1,2}]   ;;  %s2156_s2 = inlined_call_operand.vmem [shape: bf16[2,8,3,4,8], index: 2, kind: input, shape index: {}, may-alias: {0,1,2}]   ;;  %s2157_s3 = inlined_call_operand.vmem [shape: bf16[2,8,4,8], index: 3, kind: output, shape index: {}]  }
   0x1   :  { %s1858_s14 = smov 0   ;;  %s1860_s15 = smov 0  }
   0x2   :  { %s1862_s16 = smov 0  }
   0x3 LB: > { %s32_s17 = sadd.s32 1, %s1822_s15  ;;  %p48_p1 = scmp.ne.s32.totalorder %s1814_s13, %s1810_s12  ;;  %s1826_s16 = sphi %s1862_s16, %s13_s16   ;;  %s1822_s15 = sphi %s1860_s15, %s2162_s15   ;;  %s1818_s14 = sphi %s1858_s14, %s2161_s14   ;;  %s1814_s13 = sphi %s1856_s13, %s2160_s13   ;;  %s1810_s12 = sphi %s1854_s12, %s2159_s12  }
   0x4   : > { %p34_p0 = scmp.ge.s32.totalorder %s32_s17, 2  ;;  %p49_p2 = scmp.eq.s32.totalorder %s1826_s16, 0 }
   0x5   : > { %s41_s20 = sadd.s32 1, %s1814_s13  ;;  %p1587_p5 = scmp.ge.s32.totalorder %s1826_s16, 2 }
   0x6   : > { %s2164_s17 = smov (%p34_p0, %s32_s17), 0  ;;  %p1885_p3 = por %p49_p2, %p48_p1 }
   0x7   : > { %s36_s19 = ssub.s32 %s1822_s15, %s2164_s17  ;;  %158 = sbr.rel (%p1587_p5) target bundleno = 44 (0x2c), region = 16 }
   0x8   : > { %p39_p4 = scmp.eq.s32.totalorder %s36_s19, 0 }
   0xa   : > { %s1893_s21 = scalar_select %p39_p4, %s1814_s13, %s41_s20  }
   0xe   : > { %161 = sbr.rel (!%p1885_p3) target bundleno = 24 (0x18), region = 20  ;;  %s163_s22 = sand.u32 (%p1885_p3), 1, %s1814_s13  }
   0xf   : > { %s1691_s23 = smul.u32 (%p1885_p3), 48, %s1822_s15  ;;  %s1588_s24 = sshll.u32 (%p1885_p3), %s163_s22, 4 }
  0x10   : > { %s165_s28 = scalar_lea.vmem (%p1885_p3), [#allocation5], %s1588_s24 }
  0x11   : > { %s171_s27 = scalar_lea.vmem (%p1885_p3), %s2154_s0, %s1691_s23 }
  0x12   : > { %v187_v0 = vld [vmem:[%s171_s27] sm:$0x3] (%p1885_p3)  ;;  %v189_v1 = vld [vmem:[%s171_s27 + $0x6] sm:$0x3] (%p1885_p3)  ;;  %v191_v2 = vld [vmem:[%s171_s27 + $0xc] sm:$0x3] (%p1885_p3) }
  0x13   : > { %188 = vst [vmem:[%s165_s28] sm:$0x3] (%p1885_p3), %v187_v0  ;;  %190 = vst [vmem:[%s165_s28 + $0x2] sm:$0x3] (%p1885_p3), %v189_v1  ;;  %v193_v3 = vld [vmem:[%s171_s27 + $0x12] sm:$0x3] (%p1885_p3) }
  0x14   : > { %192 = vst [vmem:[%s165_s28 + $0x4] sm:$0x3] (%p1885_p3), %v191_v2  ;;  %v195_v4 = vld [vmem:[%s171_s27 + $0x18] sm:$0x3] (%p1885_p3)  ;;  %v197_v5 = vld [vmem:[%s171_s27 + $0x1e] sm:$0x3] (%p1885_p3) }
  0x15   : > { %194 = vst [vmem:[%s165_s28 + $0x6] sm:$0x3] %v193_v3  ;;  %196 = vst [vmem:[%s165_s28 + $0x8] sm:$0x3] %v195_v4  ;;  %v199_v6 = vld [vmem:[%s171_s27 + $0x24] sm:$0x3] }
  0x16   : > { %198 = vst [vmem:[%s165_s28 + $0xa] sm:$0x3] %v197_v5  ;;  %v201_v7 = vld [vmem:[%s171_s27 + $0x2a] sm:$0x3]  ;;  %200 = vst [vmem:[%s165_s28 + $0xc] sm:$0x3] %v199_v6 }
  0x17   : > { %202 = vst [vmem:[%s165_s28 + $0xe] sm:$0x3] %v201_v7 }
  0x18 PF: > { %241 = sbr.rel (!%p1885_p3) target bundleno = 34 (0x22), region = 61  ;;  %s243_s29 = sand.u32 (%p1885_p3), 1, %s1814_s13  }
  0x19   : > { %s1591_s30 = smul.u32 (%p1885_p3), 48, %s1822_s15  ;;  %s1590_s4 = sshll.u32 (%p1885_p3), %s243_s29, 4 }
  0x1a   : > { %s245_s8 = scalar_lea.vmem (%p1885_p3), [#allocation6], %s1590_s4 }
  0x1b   : > { %s1490_s7 = scalar_lea.vmem (%p1885_p3), %s2155_s1, %s1591_s30 }
  0x1c   : > { %v1592_v8 = vld [vmem:[%s1490_s7 + $0x2] sm:$0x3] (%p1885_p3)  ;;  %v1593_v9 = vld [vmem:[%s1490_s7 + $0x8] sm:$0x3] (%p1885_p3)  ;;  %v1594_v10 = vld [vmem:[%s1490_s7 + $0xe] sm:$0x3] (%p1885_p3) }
  0x1d   : > { %269 = vst [vmem:[%s245_s8] sm:$0x3] (%p1885_p3), %v1592_v8  ;;  %271 = vst [vmem:[%s245_s8 + $0x2] sm:$0x3] (%p1885_p3), %v1593_v9  ;;  %v1595_v11 = vld [vmem:[%s1490_s7 + $0x14] sm:$0x3] (%p1885_p3) }
  0x1e   : > { %273 = vst [vmem:[%s245_s8 + $0x4] sm:$0x3] (%p1885_p3), %v1594_v10  ;;  %v1596_v12 = vld [vmem:[%s1490_s7 + $0x1a] sm:$0x3] (%p1885_p3)  ;;  %v1597_v13 = vld [vmem:[%s1490_s7 + $0x20] sm:$0x3] (%p1885_p3) }
  0x1f   : > { %275 = vst [vmem:[%s245_s8 + $0x6] sm:$0x3] %v1595_v11  ;;  %277 = vst [vmem:[%s245_s8 + $0x8] sm:$0x3] %v1596_v12  ;;  %v1598_v14 = vld [vmem:[%s1490_s7 + $0x26] sm:$0x3] }
  0x20   : > { %279 = vst [vmem:[%s245_s8 + $0xa] sm:$0x3] %v1597_v13  ;;  %v1599_v15 = vld [vmem:[%s1490_s7 + $0x2c] sm:$0x3]  ;;  %281 = vst [vmem:[%s245_s8 + $0xc] sm:$0x3] %v1598_v14 }
  0x21   : > { %283 = vst [vmem:[%s245_s8 + $0xe] sm:$0x3] %v1599_v15 }
  0x22 PF: > { %322 = sbr.rel (!%p1885_p3) target bundleno = 44 (0x2c), region = 102  ;;  %s324_s9 = sand.u32 (%p1885_p3), 1, %s1814_s13  }
  0x23   : > { %s1601_s10 = smul.u32 (%p1885_p3), 48, %s1822_s15  ;;  %s1600_s11 = sshll.u32 (%p1885_p3), %s324_s9, 4 }
  0x24   : > { %s326_s23 = scalar_lea.vmem (%p1885_p3), [#allocation7], %s1600_s11 }
  0x25   : > { %s1498_s22 = scalar_lea.vmem (%p1885_p3), %s2156_s2, %s1601_s10 }
  0x26   : > { %v1602_v16 = vld [vmem:[%s1498_s22 + $0x4] sm:$0x3] (%p1885_p3)  ;;  %v1603_v17 = vld [vmem:[%s1498_s22 + $0xa] sm:$0x3] (%p1885_p3)  ;;  %v1604_v18 = vld [vmem:[%s1498_s22 + $0x10] sm:$0x3] (%p1885_p3) }
  0x27   : > { %350 = vst [vmem:[%s326_s23] sm:$0x3] (%p1885_p3), %v1602_v16  ;;  %352 = vst [vmem:[%s326_s23 + $0x2] sm:$0x3] (%p1885_p3), %v1603_v17  ;;  %v1605_v19 = vld [vmem:[%s1498_s22 + $0x16] sm:$0x3] (%p1885_p3) }
  0x28   : > { %354 = vst [vmem:[%s326_s23 + $0x4] sm:$0x3] (%p1885_p3), %v1604_v18  ;;  %v1606_v20 = vld [vmem:[%s1498_s22 + $0x1c] sm:$0x3] (%p1885_p3)  ;;  %v1607_v21 = vld [vmem:[%s1498_s22 + $0x22] sm:$0x3] (%p1885_p3) }
  0x29   : > { %356 = vst [vmem:[%s326_s23 + $0x6] sm:$0x3] %v1605_v19  ;;  %358 = vst [vmem:[%s326_s23 + $0x8] sm:$0x3] %v1606_v20  ;;  %v1608_v22 = vld [vmem:[%s1498_s22 + $0x28] sm:$0x3] }
  0x2a   : > { %360 = vst [vmem:[%s326_s23 + $0xa] sm:$0x3] %v1607_v21  ;;  %v1609_v23 = vld [vmem:[%s1498_s22 + $0x2e] sm:$0x3]  ;;  %362 = vst [vmem:[%s326_s23 + $0xc] sm:$0x3] %v1608_v22 }
  0x2b   : > { %364 = vst [vmem:[%s326_s23 + $0xe] sm:$0x3] %v1609_v23 }
  0x2c PF: > { %p1610_p6 = scmp.ge.s32.totalorder %s1826_s16, 1  ;;  %p402_p7 = scmp.lt.s32.totalorder %s1826_s16, 3 }
  0x2e   : > { %p403_p8 = pnand %p1610_p6, %p402_p7 }
  0x2f   : > { %s409_s18 = sand.u32 (!%p403_p8), 1, %s1810_s12   ;;  %vm485_vm0 = vcmask (!%p403_p8), 64512   ;;  %v509_v24 = vlaneseq (!%p403_p8)  ;;  %v1828_v25 = vmov (!%p403_p8), 0.0   ;;  %v1829_v26 = vmov (!%p403_p8), 1934713408   ;;  %p462_p9 = scmp.lt.s32.totalorder (!%p403_p8), %s1818_s14, 1 }
  0x30   : > { %406 = sbr.rel (%p403_p8) target bundleno = 892 (0x37c), region = 143  ;;  %1643 = vmatprep.subr.bf16.mxu0 (!%p403_p8), %v1828_v25  ;;  %s1921_s24 = sshll.u32 (!%p403_p8), %s409_s18, 4  ;;  %v507_v27 = vunpack.c.l.s4 (!%p403_p8), %v1829_v26  ;;  %486 = vst.msk [vmem:[#allocation4] sm:$0xff] (!%p403_p8), %vm485_vm0, %v1828_v25  ;;  %487 = vst.msk [vmem:[#allocation4 + $0x8] sm:$0xff] (!%p403_p8), %vm485_vm0, %v1828_v25  ;;  %1649 = vmatprep.subr.bf16.mxu1 (!%p403_p8), %v1828_v25  ;;  %v1830_v29 = vmov (!%p403_p8), 1983009808  }
  0x31   : > { %488 = vst.msk [vmem:[#allocation4 + $0x10] sm:$0xff] (!%p403_p8), %vm485_vm0, %v1828_v25  ;;  %489 = vst.msk [vmem:[#allocation4 + $0x18] sm:$0xff] (!%p403_p8), %vm485_vm0, %v1828_v25  ;;  %v1933_v28 = vshrl.u32 (!%p403_p8), %v509_v24, 7  ;;  %v703_v30 = vunpack.c.l.s4 (!%p403_p8), %v1830_v29  ;;  %vm1831_vm1 = vmmov (!%p403_p8), 0   ;;  %s418_s12 = scalar_lea.vmem (!%p403_p8), [#allocation6], %s1921_s24  ;;  %v1832_v32 = vmov (!%p403_p8), 0  }
  0x32   : > { %1645 = vmatprep.mubr.msk.bf16.mxu0 (!%p403_p8), %vm1831_vm1, %v1828_v25  ;;  %1651 = vmatprep.mubr.msk.bf16.mxu1 (!%p403_p8), %vm1831_vm1, %v1828_v25  ;;  %v508_v31 = vunpack.c.0.s8 (!%p403_p8), %v507_v27  ;;  %v1776_v34 = vld.sshfl [vmem:[%s418_s12] sm:$0x33 pattern:$0x73516240] (!%p403_p8)  ;;  %s411_s25 = scalar_lea.vmem (!%p403_p8), [#allocation5], %s1921_s24  ;;  %vm476_vm2 = vcmask (!%p403_p8), 7168  }
  0x33   : > { %1738 = vset.pattern.permute.xlu0 (!%p403_p8), %v1832_v32  ;;  %1739 = vset.pattern.permute.xlu1 (!%p403_p8), %v1832_v32  ;;  %v704_v35 = vunpack.c.0.s8 (!%p403_p8), %v703_v30  ;;  %v1777_v36 = vld.sshfl [vmem:[%s418_s12 + $0x2] sm:$0x33 pattern:$0x73516240] (!%p403_p8)  ;;  %v612_v40 = vshrl.u32 (!%p403_p8), %v1776_v34, 16  ;;  %v581_v41 = vcombine.high (!%p403_p8), %v1776_v34, %v1832_v32  ;;  %481 = vst.msk [vmem:[#allocation3] sm:$0xff] (!%p403_p8), %vm476_vm2, %v1828_v25 }
  0x34   : > { %v1943_v33 = vsub.s32 (!%p403_p8), %v508_v31, %v1933_v28  ;;  %v1778_v37 = vld.sshfl [vmem:[%s418_s12 + $0x8] sm:$0x33 pattern:$0x73516240] (!%p403_p8)  ;;  %v611_v42 = vpack.i.b16 (!%p403_p8), %v1777_v36, %v1776_v34  ;;  %v613_v44 = vshrl.u32 (!%p403_p8), %v1777_v36, 16  ;;  %v590_v51 = vcombine.high (!%p403_p8), %v1777_v36, %v1832_v32  ;;  %482 = vst.msk [vmem:[#allocation3 + $0x8] sm:$0xff] (!%p403_p8), %vm476_vm2, %v1828_v25 }
  0x35   : > { %v1779_v38 = vld.sshfl [vmem:[%s418_s12 + $0xa] sm:$0x33 pattern:$0x73516240] (!%p403_p8)  ;;  %v1947_v39 = vsub.s32 (!%p403_p8), %v704_v35, %v1933_v28  ;;  %v624_v45 = vshrl.u32 (!%p403_p8), %v1778_v37, 16  ;;  %v599_v52 = vcombine.high (!%p403_p8), %v1778_v37, %v1832_v32  ;;  %v618_v5 = vshrl.u32 (!%p403_p8), %v581_v41, 16 }
  0x36   : > { %v623_v43 = vpack.i.b16 (!%p403_p8), %v1779_v38, %v1778_v37  ;;  %v1780_v46 = vld.sshfl [vmem:[%s411_s25] sm:$0x33 pattern:$0x73516240] (!%p403_p8)  ;;  %v625_v48 = vshrl.u32 (!%p403_p8), %v1779_v38, 16  ;;  %v608_v53 = vcombine.high (!%p403_p8), %v1779_v38, %v1832_v32  ;;  %v614_v55 = vpack.i.b16 (!%p403_p8), %v613_v44, %v612_v40  ;;  %483 = vst.msk [vmem:[#allocation3 + $0x10] sm:$0xff] (!%p403_p8), %vm476_vm2, %v1828_v25 }
  0x37   : > { %v1781_v47 = vld.sshfl [vmem:[%s411_s25 + $0x2] sm:$0x33 pattern:$0x73516240]  ;;  %v617_v57 = vpack.i.b16 %v590_v51, %v581_v41  ;;  %v544_v61 = vshrl.u32 %v1780_v46, 16  ;;  %v619_v9 = vshrl.u32 %v590_v51, 16  ;;  %v513_v16 = vcombine.high %v1780_v46, %v1832_v32 }
  0x38   : > { %v1782_v49 = vld.sshfl [vmem:[%s411_s25 + $0x8] sm:$0x33 pattern:$0x73516240]  ;;  %v709_v54 = vcombine.low %v611_v42, %v623_v43  ;;  %v626_v56 = vpack.i.b16 %v625_v48, %v624_v45  ;;  %v543_v59 = vpack.i.b16 %v1781_v47, %v1780_v46  ;;  %v629_v60 = vpack.i.b16 %v608_v53, %v599_v52  ;;  %484 = vst.msk [vmem:[#allocation3 + $0x18] sm:$0xff] %vm476_vm2, %v1828_v25  ;;  %s425_s26 = scalar_lea.vmem [#allocation7], %s1921_s24 }
  0x39   : > { %v1783_v50 = vld.sshfl [vmem:[%s411_s25 + $0xa] sm:$0x33 pattern:$0x73516240]  ;;  %v545_v0 = vshrl.u32 %v1781_v47, 16  ;;  %v556_v1 = vshrl.u32 %v1782_v49, 16  ;;  %v620_v15 = vpack.i.b16 %v619_v9, %v618_v5  ;;  %v522_v20 = vcombine.high %v1781_v47, %v1832_v32 }
  0x3a   : > { %v716_v58 = vrot.slane %v709_v54, %v1947_v39  ;;  %v772_v62 = vcombine.low %v614_v55, %v626_v56  ;;  %v555_v63 = vpack.i.b16 %v1783_v50, %v1782_v49  ;;  %v834_v3 = vcombine.low %v617_v57, %v629_v60  ;;  %s2166_s14 = smov (!%p462_p9, %s1818_s14), 1 }
  0x3b   : > { %v557_v4 = vshrl.u32 %v1783_v50, 16  ;;  %v546_v8 = vpack.i.b16 %v545_v0, %v544_v61  ;;  %v630_v12 = vshrl.u32 %v599_v52, 16  ;;  %v631_v13 = vshrl.u32 %v608_v53, 16  ;;  %s1626_s27 = sshll.u32 %s2166_s14, 4 }
  0x3c   : > { %v722_v2 = vsel %vm485_vm0, %v716_v58, 0  ;;  %v779_v6 = vrot.slane %v772_v62, %v1947_v39  ;;  %v701_v7 = vcombine.low %v543_v59, %v555_v63  ;;  %v841_v10 = vrot.slane %v834_v3, %v1947_v39  ;;  %s469_s30 = scalar_lea.vmem %s2157_s3, %s1626_s27 }
  0x3d   : > { %1644 = vmatpush3.bf16.xpose.msra.mxu0 %v722_v2  ;;  %v558_v11 = vpack.i.b16 %v557_v4, %v556_v1  ;;  %v632_v19 = vpack.i.b16 %v631_v13, %v630_v12  ;;  %v531_v21 = vcombine.high %v1782_v49, %v1832_v32  ;;  %v540_v22 = vcombine.high %v1783_v50, %v1832_v32 }
  0x3e   : > { %1655 = vmatprep.subr.bf16.mxu0 %v1828_v25  ;;  %v784_v14 = vsel %vm485_vm0, %v779_v6, 0  ;;  %v708_v17 = vrot.slane %v701_v7, %v1947_v39  ;;  %v550_v23 = vshrl.u32 %v513_v16, 16  ;;  %v846_v26 = vsel %vm485_vm0, %v841_v10, 0 }
  0x3f   : > { %1650 = vmatpush3.bf16.xpose.msra.mxu1 %v784_v14  ;;  %v764_v18 = vcombine.low %v546_v8, %v558_v11  ;;  %v896_v27 = vcombine.low %v620_v15, %v632_v19  ;;  %v549_v29 = vpack.i.b16 %v522_v20, %v513_v16  ;;  %v551_v30 = vshrl.u32 %v522_v20, 16 }
  0x40   : > { %1661 = vmatprep.subr.bf16.mxu1 %v1828_v25  ;;  %v561_v34 = vpack.i.b16 %v540_v22, %v531_v21  ;;  %v562_v35 = vshrl.u32 %v531_v21, 16  ;;  %v563_v36 = vshrl.u32 %v540_v22, 16  ;;  %v1833_v46 = vmov -inf  }
  0x41   : > { %v771_v31 = vrot.slane %v764_v18, %v1947_v39  ;;  %v903_v37 = vrot.slane %v896_v27, %v1947_v39  ;;  %v552_v38 = vpack.i.b16 %v551_v30, %v550_v23  ;;  %477 = vst.msk [vmem:[#allocation2] sm:$0xff] %vm476_vm2, %v1833_v46  ;;  %478 = vst.msk [vmem:[#allocation2 + $0x8] sm:$0xff] %vm476_vm2, %v1833_v46  ;;  %v959_v47 = vand.u32 127, %v509_v24 }
  0x42   : > { %v826_v40 = vcombine.low %v549_v29, %v561_v34  ;;  %v564_v41 = vpack.i.b16 %v563_v36, %v562_v35  ;;  %479 = vst.msk [vmem:[#allocation2 + $0x10] sm:$0xff] %vm476_vm2, %v1833_v46  ;;  %480 = vst.msk [vmem:[#allocation2 + $0x18] sm:$0xff] %vm476_vm2, %v1833_v46  ;;  %v1784_v22 = vld.sshfl [vmem:[%s425_s26] sm:$0x33 pattern:$0x73516240] }
  0x43   : > { %v908_v42 = vsel %vm485_vm0, %v903_v37, 0  ;;  %vm962_vm3 = vcmp.le.s32.totalorder %v959_v47, %v1933_v28  ;;  %v1785_v23 = vld.sshfl [vmem:[%s425_s26 + $0x2] sm:$0x33 pattern:$0x73516240]  ;;  %v680_v35 = vshrl.u32 %v1784_v22, 16 }
  0x44   : > { %1646 = vmatmul.mubr.msk.bf16.vlgmr.msra.gmra.mrb[0].mxu0 %vm485_vm0, %v708_v17  ;;  %v888_v43 = vcombine.low %v552_v38, %v564_v41  ;;  %v833_v44 = vrot.slane %v826_v40, %v1947_v39  ;;  %v1787_v29 = vld.sshfl [vmem:[%s425_s26 + $0xa] sm:$0x33 pattern:$0x73516240]  ;;  %v679_v34 = vpack.i.b16 %v1785_v23, %v1784_v22  ;;  %v681_v36 = vshrl.u32 %v1785_v23, 16 }
  0x45   : > { %1656 = vmatpush3.bf16.xpose.msra.mxu0 %v846_v26  ;;  %1657 = vmatprep.mubr.msk.bf16.mxu0 %vm1831_vm1, %v1828_v25  ;;  %v1786_v26 = vld.sshfl [vmem:[%s425_s26 + $0x8] sm:$0x33 pattern:$0x73516240]  ;;  %v693_v41 = vshrl.u32 %v1787_v29, 16  ;;  %vm1105_vm4 = vcmask 1043456   ;;  %v658_v46 = vcombine.high %v1785_v23, %v1832_v32 }
  0x46   : > { %1667 = vmatprep.subr.bf16.mxu0 %v1828_v25  ;;  %1652 = vmatmul.mubr.msk.bf16.vlgmr.msra.gmra.mrb[0].mxu1 %vm485_vm0, %v771_v31  ;;  %v895_v45 = vrot.slane %v888_v43, %v1947_v39  ;;  %v692_v37 = vshrl.u32 %v1786_v26, 16  ;;  %v691_v40 = vpack.i.b16 %v1787_v29, %v1786_v26  ;;  %v667_v47 = vcombine.high %v1786_v26, %v1832_v32 }
  0x47   : > { %1662 = vmatpush3.bf16.xpose.msra.mxu1 %v908_v42  ;;  %1663 = vmatprep.mubr.msk.bf16.mxu1 %vm1831_vm1, %v1828_v25  ;;  %v682_v42 = vpack.i.b16 %v681_v36, %v680_v35  ;;  %vm1438_vm5 = vcmask 58368  }
  0x48   : > { %1673 = vmatprep.subr.bf16.mxu1 %v1828_v25  ;;  %v2023_v11 = vld [vmem:[#allocation2] sm:$0xff]  ;;  %v2028_v14 = vld [vmem:[#allocation2 + $0x8] sm:$0xff]  ;;  %v1094_v43 = vcombine.low %v679_v34, %v691_v40 }
  0x49   : > { %v2038_v17 = vld [vmem:[#allocation2 + $0x10] sm:$0xff]  ;;  %v2049_v21 = vld [vmem:[#allocation2 + $0x18] sm:$0xff] }
  0x4c   : > { %1658 = vmatmul.mubr.msk.bf16.vlgmr.msra.gmra.mrb[4].mxu0 %vm485_vm0, %v833_v44  ;;  %v694_v44 = vpack.i.b16 %v693_v41, %v692_v37 }
  0x4d   : > { %1669 = vmatprep.mubr.msk.bf16.mxu0 %vm1831_vm1, %v1828_v25 }
  0x4e   : > { %1664 = vmatmul.mubr.msk.bf16.vlgmr.msra.gmra.mrb[4].mxu1 %vm485_vm0, %v895_v45  ;;  %v649_v45 = vcombine.high %v1784_v22, %v1832_v32 }
  0x4f   : > { %1675 = vmatprep.mubr.msk.bf16.mxu1 %vm1831_vm1, %v1828_v25 }
 0x117   : > { %v758_v48 = vpop.f32.mrb[0].mxu0 }
 0x118   : > { %v950_v49 = vmul.f32 0.35355338, %v758_v48  ;;  %v1647_v50 = vpop.f32.mrb[1].mxu0  ;;  %v676_v48 = vcombine.high %v1787_v29, %v1832_v32 }
 0x119   : > { %v761_v51 = vpop.f32.mrb[2].mxu0  ;;  %v820_v52 = vpop.f32.mrb[0].mxu1  ;;  %v1149_v50 = vcombine.low %v682_v42, %v694_v44 }
 0x11a   : > { %v1648_v53 = vpop.f32.mrb[3].mxu0  ;;  %v2001_v54 = vsel %vm962_vm3, %v950_v49, -inf  ;;  %v951_v55 = vmul.f32 0.35355338, %v820_v52  ;;  %v1653_v56 = vpop.f32.mrb[1].mxu1  ;;  %v1101_v49 = vrot.slane %v1094_v43, %v1947_v39  ;;  %v685_v51 = vpack.i.b16 %v658_v46, %v649_v45 }
 0x11b   : > { %v973_v57 = vsel %vm485_vm0, %v2001_v54, -inf  ;;  %v823_v58 = vpop.f32.mrb[2].mxu1  ;;  %v697_v52 = vpack.i.b16 %v676_v48, %v667_v47  ;;  %v686_v56 = vshrl.u32 %v649_v45, 16 }
 0x11c   : > { %974 = vmax.xlane.f32.xlu0 %v973_v57  ;;  %v1654_v24 = vpop.f32.mrb[3].mxu1  ;;  %v2007_v59 = vsel %vm962_vm3, %v951_v55, -inf  ;;  %v1107_v53 = vsel %vm1105_vm4, %v1101_v49, 0  ;;  %v1156_v55 = vrot.slane %v1149_v50, %v1947_v39  ;;  %v687_v57 = vshrl.u32 %v658_v46, 16  ;;  %v1036_v50 = vld [vmem:[#allocation3 + $0x18] sm:$0xff] }
 0x11d   : > { %v976_v60 = vsel %vm485_vm0, %v2007_v59, -inf  ;;  %1668 = vmatpush3.bf16.msra.mxu0 %v1107_v53  ;;  %v1203_v58 = vcombine.low %v685_v51, %v697_v52  ;;  %v698_v24 = vshrl.u32 %v667_v47, 16 }
 0x11e   : > { %1679 = vmatprep.subr.bf16.mxu0 %v1828_v25  ;;  %v688_v32 = vpack.i.b16 %v687_v57, %v686_v56 }
 0x11f   : > { %v882_v61 = vpop.f32.mrb[4].mxu0 }
 0x120   : > { %v952_v62 = vmul.f32 0.35355338, %v882_v61  ;;  %977 = vmax.xlane.f32.xlu0 %v976_v60  ;;  %v1659_v63 = vpop.f32.mrb[5].mxu0  ;;  %v699_v60 = vshrl.u32 %v676_v48, 16  ;;  %v1161_v61 = vsel %vm1105_vm4, %v1156_v55, 0  ;;  %v1034_v48 = vld [vmem:[#allocation3 + $0x8] sm:$0xff] }
 0x121   : > { %v885_v0 = vpop.f32.mrb[6].mxu0  ;;  %v944_v1 = vpop.f32.mrb[4].mxu1  ;;  %1674 = vmatpush3.bf16.msra.mxu1 %v1161_v61 }
 0x122   : > { %v1660_v2 = vpop.f32.mrb[7].mxu0  ;;  %v2013_v3 = vsel %vm962_vm3, %v952_v62, -inf  ;;  %v953_v4 = vmul.f32 0.35355338, %v944_v1  ;;  %v1665_v5 = vpop.f32.mrb[5].mxu1  ;;  %v1210_v62 = vrot.slane %v1203_v58, %v1947_v39  ;;  %v700_v63 = vpack.i.b16 %v699_v60, %v698_v24  ;;  %1685 = vmatprep.subr.bf16.mxu1 %v1828_v25 }
 0x123   : > { %v979_v6 = vsel %vm485_vm0, %v2013_v3, -inf  ;;  %v947_v7 = vpop.f32.mrb[6].mxu1 }
 0x124   : > { %980 = vmax.xlane.f32.xlu1 %v979_v6  ;;  %v1666_v8 = vpop.f32.mrb[7].mxu1  ;;  %v2019_v9 = vsel %vm962_vm3, %v953_v4, -inf  ;;  %v1215_v0 = vsel %vm1105_vm4, %v1210_v62, 0  ;;  %v1257_v1 = vcombine.low %v688_v32, %v700_v63  ;;  %v1062_v63 = vld [vmem:[#allocation4] sm:$0xff] }
 0x125   : > { %v982_v10 = vsel %vm485_vm0, %v2019_v9, -inf }
 0x126   : > { %v1264_v2 = vrot.slane %v1257_v1, %v1947_v39 }
 0x128   : > { %983 = vmax.xlane.f32.xlu1 %v982_v10  ;;  %v1269_v4 = vsel %vm1105_vm4, %v1264_v2, 0  ;;  %v1063_v2 = vld [vmem:[#allocation4 + $0x8] sm:$0xff] }
 0x1a9   : > { %v975_v12 = vpop.xlane.xlu0 %974 }
 0x1aa   : > { %v2026_v13 = vmax.f32 %v2023_v11, %v975_v12 }
 0x1ac   : > { %v989_v15 = vsub.f32 %v2023_v11, %v2026_v13  ;;  %1319 = vst.msk [vmem:[#allocation2] sm:$0xff] %vm476_vm2, %v2026_v13  ;;  %1003 = vperm.xlu0 %1738, %v2026_v13   ;;  %v1033_v13 = vld [vmem:[#allocation3] sm:$0xff] }
 0x1ad   : > { %v978_v28 = vpop.xlane.xlu0 %977 }
 0x1ae   : > { %v2036_v16 = vmax.f32 %v2028_v14, %v978_v28  ;;  %v993_v44 = vmul.f32 1.442695, %v989_v15 }
 0x1b0   : > { %v990_v18 = vsub.f32 %v2028_v14, %v2036_v16  ;;  %1320 = vst.msk [vmem:[#allocation2 + $0x8] sm:$0xff] %vm476_vm2, %v2036_v16  ;;  %1008 = vperm.xlu1 %1739, %v2036_v16  }
 0x1b1   : > { %v981_v19 = vpop.xlane.xlu1 %980 }
 0x1b2   : > { %v2047_v20 = vmax.f32 %v2038_v17, %v981_v19  ;;  %v995_v41 = vmul.f32 1.442695, %v990_v18 }
 0x1b4   : > { %v991_v27 = vsub.f32 %v2038_v17, %v2047_v20  ;;  %1321 = vst.msk [vmem:[#allocation2 + $0x10] sm:$0xff] %vm476_vm2, %v2047_v20  ;;  %1013 = vperm.xlu1 %1739, %v2047_v20  }
 0x1b5   : > { %v984_v30 = vpop.xlane.xlu1 %983 }
 0x1b6   : > { %v2057_v31 = vmax.f32 %v2049_v21, %v984_v30  ;;  %v997_v45 = vmul.f32 1.442695, %v991_v27 }
 0x1b8   : > { %v992_v38 = vsub.f32 %v2049_v21, %v2057_v31  ;;  %1322 = vst.msk [vmem:[#allocation2 + $0x18] sm:$0xff] %vm476_vm2, %v2057_v31  ;;  %1018 = vperm.xlu1 %1739, %v2057_v31   ;;  %v1035_v21 = vld [vmem:[#allocation3 + $0x10] sm:$0xff] }
 0x1ba   : > { %v999_v14 = vmul.f32 1.442695, %v992_v38 }
 0x22b   : > { %v1004_v5 = vpop.permute.xlu0 %1003 }
 0x22c   : > { %v1021_v6 = vsub.f32 %v2001_v54, %v1004_v5 }
 0x22e   : > { %v1025_v7 = vmul.f32 1.442695, %v1021_v6 }
 0x22f   : > { %v1009_v8 = vpop.permute.xlu1 %1008 }
 0x230   : > { %1752 = vpow2.f32 %v1025_v7  ;;  %v1022_v10 = vsub.f32 %v2007_v59, %v1009_v8 }
 0x232   : > { %v1027_v12 = vmul.f32 1.442695, %v1022_v10 }
 0x233   : > { %v1014_v28 = vpop.permute.xlu1 %1013 }
 0x234   : > { %1754 = vpow2.f32 %v1027_v12  ;;  %v1023_v19 = vsub.f32 %v2013_v3, %v1014_v28 }
 0x236   : > { %v1029_v22 = vmul.f32 1.442695, %v1023_v19  ;;  %v1064_v19 = vld [vmem:[#allocation4 + $0x10] sm:$0xff] }
 0x237   : > { %v1019_v23 = vpop.permute.xlu1 %1018 }
 0x238   : > { %1756 = vpow2.f32 %v1029_v22  ;;  %v1024_v26 = vsub.f32 %v2019_v9, %v1019_v23 }
 0x23a   : > { %v1753_v29 = vpop.eup %1752  ;;  %v1031_v30 = vmul.f32 1.442695, %v1024_v26 }
 0x23b   : > { %v1041_v34 = vsel %vm485_vm0, %v1753_v29, 0.0  ;;  %v1090_v54 = vpack.c.bf16 %v1753_v29, %v1753_v29 }
 0x23c   : > { %1758 = vpow2.f32 %v1031_v30  ;;  %1042 = vadd.xlane.f32.xlu1 %v1041_v34 }
 0x23d   : > { %1670 = vmatmul.mubr.msk.bf16.vlgmr.msra.gmra.mrb[8].mxu0 %vm485_vm0, %v1090_v54  ;;  %1760 = vpow2.f32 %v995_v41  ;;  %v1065_v54 = vld [vmem:[#allocation4 + $0x18] sm:$0xff] }
 0x23e   : > { %v1755_v59 = vpop.eup %1754  ;;  %1680 = vmatpush3.bf16.msra.mxu0 %v1215_v0  ;;  %1681 = vmatprep.mubr.msk.bf16.mxu0 %vm1831_vm1, %v1828_v25  ;;  %1762 = vpow2.f32 %v993_v44 }
 0x23f   : > { %v1044_v3 = vsel %vm485_vm0, %v1755_v59, 0.0  ;;  %v1091_v35 = vpack.c.bf16 %v1755_v59, %v1755_v59  ;;  %1764 = vpow2.f32 %v997_v45 }
 0x240   : > { %1045 = vadd.xlane.f32.xlu0 %v1044_v3  ;;  %1766 = vpow2.f32 %v999_v14 }
 0x241   : > { %1676 = vmatmul.mubr.msk.bf16.vlgmr.msra.gmra.mrb[8].mxu1 %vm485_vm0, %v1091_v35 }
 0x242   : > { %v1757_v9 = vpop.eup %1756  ;;  %1686 = vmatpush3.bf16.msra.mxu1 %v1269_v4  ;;  %1687 = vmatprep.mubr.msk.bf16.mxu1 %vm1831_vm1, %v1828_v25 }
 0x243   : > { %v1047_v36 = vsel %vm485_vm0, %v1757_v9, 0.0  ;;  %v1092_v37 = vpack.c.bf16 %v1757_v9, %v1757_v9 }
 0x244   : > { %1048 = vadd.xlane.f32.xlu1 %v1047_v36 }
 0x245   : > { %1682 = vmatmul.mubr.msk.bf16.vlgmr.msra.gmra.mrb[12].mxu0 %vm485_vm0, %v1092_v37 }
 0x246   : > { %v1759_v40 = vpop.eup %1758 }
 0x247   : > { %v1050_v42 = vsel %vm485_vm0, %v1759_v40, 0.0  ;;  %v1093_v43 = vpack.c.bf16 %v1759_v40, %v1759_v40  ;;  %v1761_v16 = vpop.eup %1760 }
 0x248   : > { %1051 = vadd.xlane.f32.xlu1 %v1050_v42  ;;  %v1763_v18 = vpop.eup %1762  ;;  %v1038_v20 = vmul.f32 %v1761_v16, %v1034_v48 }
 0x249   : > { %1688 = vmatmul.mubr.msk.bf16.vlgmr.msra.gmra.mrb[12].mxu1 %vm485_vm0, %v1093_v43  ;;  %v1765_v46 = vpop.eup %1764  ;;  %v1037_v15 = vmul.f32 %v1763_v18, %v1033_v13 }
 0x24a   : > { %v1767_v11 = vpop.eup %1766  ;;  %v1039_v38 = vmul.f32 %v1765_v46, %v1035_v21 }
 0x24b   : > { %v1040_v53 = vmul.f32 %v1767_v11, %v1036_v50 }
 0x256   : > { %1073 = vperm.xlu0 %1738, %v1761_v16  }
 0x259   : > { %1068 = vperm.xlu1 %1739, %v1763_v18  }
 0x25d   : > { %1078 = vperm.xlu1 %1739, %v1765_v46  }
 0x261   : > { %1083 = vperm.xlu1 %1739, %v1767_v11  }
 0x2c9   : > { %v1043_v47 = vpop.xlane.xlu1 %1042 }
 0x2ca   : > { %v1053_v17 = vadd.f32 %v1043_v47, %v1037_v15 }
 0x2cc   : > { %1058 = vst.msk [vmem:[#allocation3] sm:$0xff] %vm476_vm2, %v1053_v17 }
 0x2cd   : > { %v1046_v27 = vpop.xlane.xlu0 %1045 }
 0x2ce   : > { %v1054_v31 = vadd.f32 %v1046_v27, %v1038_v20 }
 0x2d0   : > { %1059 = vst.msk [vmem:[#allocation3 + $0x8] sm:$0xff] %vm476_vm2, %v1054_v31 }
 0x2d1   : > { %v1049_v49 = vpop.xlane.xlu1 %1048 }
 0x2d2   : > { %v1055_v51 = vadd.f32 %v1049_v49, %v1039_v38 }
 0x2d3   : > { %v1330_v52 = vld [vmem:[#allocation3] sm:$0xff] }
 0x2d4   : > { %1060 = vst.msk [vmem:[#allocation3 + $0x10] sm:$0xff] %vm476_vm2, %v1055_v51  ;;  %1768 = vrcp.f32 %v1330_v52 }
 0x2d5   : > { %v1052_v55 = vpop.xlane.xlu1 %1051  ;;  %v1074_v4 = vpop.permute.xlu0 %1073 }
 0x2d6   : > { %v1056_v56 = vadd.f32 %v1052_v55, %v1040_v53  ;;  %v1087_v12 = vmul.f32 %v1074_v4, %v1063_v2 }
 0x2d7   : > { %v1331_v57 = vld [vmem:[#allocation3 + $0x8] sm:$0xff] }
 0x2d8   : > { %1061 = vst.msk [vmem:[#allocation3 + $0x18] sm:$0xff] %vm476_vm2, %v1056_v56  ;;  %1770 = vrcp.f32 %v1331_v57 }
 0x2d9   : > { %v1069_v0 = vpop.permute.xlu1 %1068 }
 0x2da   : > { %v1086_v1 = vmul.f32 %v1069_v0, %v1062_v63 }
 0x2db   : > { %v1332_v58 = vld [vmem:[#allocation3 + $0x10] sm:$0xff] }
 0x2dc   : > { %1772 = vrcp.f32 %v1332_v58 }
 0x2dd   : > { %v1079_v8 = vpop.permute.xlu1 %1078 }
 0x2de   : > { %v1769_v24 = vpop.eup %1768  ;;  %v1088_v30 = vmul.f32 %v1079_v8, %v1064_v19 }
 0x2df   : > { %1340 = vperm.xlu1 %1739, %v1769_v24   ;;  %v1333_v60 = vld [vmem:[#allocation3 + $0x18] sm:$0xff] }
 0x2e0   : > { %1774 = vrcp.f32 %v1333_v60 }
 0x2e1   : > { %v1084_v59 = vpop.permute.xlu1 %1083 }
 0x2e2   : > { %v1771_v61 = vpop.eup %1770  ;;  %v1089_v37 = vmul.f32 %v1084_v59, %v1065_v54 }
 0x2e3   : > { %1345 = vperm.xlu0 %1738, %v1771_v61  }
 0x2e6   : > { %v1773_v32 = vpop.eup %1772 }
 0x2e7   : > { %1350 = vperm.xlu1 %1739, %v1773_v32  }
 0x2ea   : > { %v1775_v62 = vpop.eup %1774 }
 0x2eb   : > { %1355 = vperm.xlu0 %1738, %v1775_v62  }
 0x310   : > { %v1143_v5 = vpop.f32.mrb[8].mxu0 }
 0x311   : > { %v1311_v6 = vadd.f32 %v1143_v5, %v1086_v1  ;;  %v1671_v7 = vpop.f32.mrb[9].mxu0 }
 0x312   : > { %v1146_v10 = vpop.f32.mrb[10].mxu0 }
 0x313   : > { %1315 = vst.msk [vmem:[#allocation4] sm:$0xff] %vm485_vm0, %v1311_v6  ;;  %v1672_v28 = vpop.f32.mrb[11].mxu0 }
 0x314   : > { %v1197_v22 = vpop.f32.mrb[8].mxu1 }
 0x315   : > { %v1312_v23 = vadd.f32 %v1197_v22, %v1087_v12  ;;  %v1677_v26 = vpop.f32.mrb[9].mxu1 }
 0x316   : > { %v1200_v29 = vpop.f32.mrb[10].mxu1 }
 0x317   : > { %1316 = vst.msk [vmem:[#allocation4 + $0x8] sm:$0xff] %vm485_vm0, %v1312_v23  ;;  %v1678_v34 = vpop.f32.mrb[11].mxu1 }
 0x318   : > { %v1251_v3 = vpop.f32.mrb[12].mxu0 }
 0x319   : > { %v1313_v35 = vadd.f32 %v1251_v3, %v1088_v30  ;;  %v1683_v9 = vpop.f32.mrb[13].mxu0 }
 0x31a   : > { %v1254_v36 = vpop.f32.mrb[14].mxu0  ;;  %v1326_v13 = vld [vmem:[#allocation4] sm:$0xff] }
 0x31b   : > { %1317 = vst.msk [vmem:[#allocation4 + $0x10] sm:$0xff] %vm485_vm0, %v1313_v35  ;;  %v1684_v40 = vpop.f32.mrb[15].mxu0 }
 0x31c   : > { %v1305_v41 = vpop.f32.mrb[12].mxu1 }
 0x31d   : > { %v1314_v42 = vadd.f32 %v1305_v41, %v1089_v37  ;;  %v1689_v43 = vpop.f32.mrb[13].mxu1 }
 0x31e   : > { %v1308_v44 = vpop.f32.mrb[14].mxu1  ;;  %v1327_v47 = vld [vmem:[#allocation4 + $0x8] sm:$0xff] }
 0x31f   : > { %1318 = vst.msk [vmem:[#allocation4 + $0x18] sm:$0xff] %vm485_vm0, %v1314_v42  ;;  %v1690_v45 = vpop.f32.mrb[15].mxu1 }
 0x322   : > { %v1328_v46 = vld [vmem:[#allocation4 + $0x10] sm:$0xff] }
 0x326   : > { %v1329_v17 = vld [vmem:[#allocation4 + $0x18] sm:$0xff] }
 0x35e   : > { %v1341_v14 = vpop.permute.xlu1 %1340 }
 0x35f   : > { %v1358_v15 = vmul.f32 %v1341_v14, %v1326_v13 }
 0x362   : > { %v1346_v16 = vpop.permute.xlu0 %1345 }
 0x363   : > { %v1359_v20 = vmul.f32 %v1346_v16, %v1327_v47 }
 0x366   : > { %v1351_v18 = vpop.permute.xlu1 %1350 }
 0x367   : > { %v1360_v11 = vmul.f32 %v1351_v18, %v1328_v46 }
 0x369   : > { %v1362_v27 = vcombine.low %v1358_v15, %v1360_v11  ;;  %v1363_v21 = vcombine.high %v1358_v15, %v1360_v11 }
 0x36a   : > { %v1356_v48 = vpop.permute.xlu0 %1355 }
 0x36b   : > { %v1361_v31 = vmul.f32 %v1356_v48, %v1329_v17  ;;  %v1370_v50 = vrot.slane %v1362_v27, %v1947_v39  ;;  %v1377_v51 = vrot.slane %v1363_v21, %v1947_v39 }
 0x36d   : > { %v1378_v38 = vcombine.low %v1359_v20, %v1361_v31  ;;  %v1379_v49 = vcombine.high %v1359_v20, %v1361_v31 }
 0x36f   : > { %v1386_v52 = vrot.slane %v1378_v38, %v1947_v39  ;;  %v1393_v53 = vrot.slane %v1379_v49, %v1947_v39 }
 0x371   : > { %v1394_v55 = vcombine.low %v1370_v50, %v1386_v52  ;;  %v1395_v56 = vcombine.high %v1370_v50, %v1386_v52  ;;  %v1410_v57 = vcombine.low %v1377_v51, %v1393_v53  ;;  %v1411_v58 = vcombine.high %v1377_v51, %v1393_v53 }
 0x373   : > { %v1402_v24 = vrot.slane %v1394_v55, %v1943_v33  ;;  %v1409_v60 = vrot.slane %v1395_v56, %v1943_v33  ;;  %v1418_v61 = vrot.slane %v1410_v57, %v1943_v33  ;;  %v1425_v32 = vrot.slane %v1411_v58, %v1943_v33 }
 0x375   : > { %v1426_v39 = vcombine.high %v1402_v24, %v1828_v25  ;;  %v1427_v62 = vcombine.high %v1409_v60, %v1828_v25  ;;  %v1428_v63 = vcombine.high %v1418_v61, %v1828_v25  ;;  %v1429_v0 = vcombine.high %v1425_v32, %v1828_v25 }
 0x376   : > { %v1430_v1 = vpack.c.bf16 %v1402_v24, %v1402_v24  ;;  %v1432_v2 = vpack.c.bf16 %v1409_v60, %v1409_v60  ;;  %v1434_v4 = vpack.c.bf16 %v1418_v61, %v1418_v61  ;;  %v1436_v5 = vpack.c.bf16 %v1425_v32, %v1425_v32 }
 0x377   : > { %v1431_v6 = vpack.c.bf16 %v1426_v39, %v1426_v39  ;;  %v1433_v7 = vpack.c.bf16 %v1427_v62, %v1427_v62  ;;  %v1435_v33 = vpack.c.bf16 %v1428_v63, %v1428_v63  ;;  %v1437_v8 = vpack.c.bf16 %v1429_v0, %v1429_v0 }
 0x378   : > { %1439 = vst.msk [vmem:[%s469_s30] sm:$0x3] %vm1438_vm5, %v1430_v1  ;;  %1441 = vst.msk [vmem:[%s469_s30 + $0x4] sm:$0x3] %vm1438_vm5, %v1432_v2 }
 0x379   : > { %1443 = vst.msk [vmem:[%s469_s30 + $0x8] sm:$0x3] %vm1438_vm5, %v1434_v4  ;;  %1445 = vst.msk [vmem:[%s469_s30 + $0xc] sm:$0x3] %vm1438_vm5, %v1436_v5 }
 0x37a   : > { %1440 = vst.msk [vmem:[%s469_s30 + $0x2] sm:$0x3] %vm1438_vm5, %v1431_v6  ;;  %1442 = vst.msk [vmem:[%s469_s30 + $0x6] sm:$0x3] %vm1438_vm5, %v1433_v7 }
 0x37b   : > { %1444 = vst.msk [vmem:[%s469_s30 + $0xa] sm:$0x3] %vm1438_vm5, %v1435_v33  ;;  %1446 = vst.msk [vmem:[%s469_s30 + $0xe] sm:$0x3] %vm1438_vm5, %v1437_v8 }
 0x37c PF: > { %s13_s16 = sadd.s32 1, %s1826_s16   ;;  %s2159_s12 = smov %s1814_s13 }
 0x37d   : > { %p10_p10 = scmp.ge.s32.totalorder %s13_s16, 4   ;;  %s2160_s13 = smov %s1893_s21 }
 0x37e   : > { %s2161_s14 = smov %s1822_s15  ;;  %s2162_s15 = smov %s2164_s17 }
 0x37f   :  { %12 = sbr.rel (!%p10_p10) target bundleno = 3 (0x3), region = 218 }

// kernel: gpt_forward.15
= control target key start
LH: loop header
LB: loop body
LE: loop exit
PB: predicated region body
PF: predicated region fallthrough
CT: control target
= control target key end

     0   :  { %vm22_vm0 = vcmask 261120   ;;  %v238_v0 = vmov 0.0   ;;  %vm239_vm1 = vmmov 0   ;;  %vm173_vm2 = vcmask 257024   ;;  %s308_s1 = inlined_call_operand.vmem [shape: bf16[128,32], index: 1, kind: input, shape index: {}]   ;;  %s309_s0 = inlined_call_operand.vmem [shape: bf16[16,128], index: 0, kind: input, shape index: {}]   ;;  %s310_s3 = inlined_call_operand.vmem [shape: bf16[16,32], index: 3, kind: input, shape index: {}]   ;;  %s311_s2 = inlined_call_operand.vmem [shape: f32[1,32], index: 2, kind: input, shape index: {}]   ;;  %s312_s4 = inlined_call_operand.vmem [shape: bf16[16,32], index: 4, kind: output, shape index: {}]  }
   0x1   :  { %207 = vmatprep.subr.bf16.mxu0 %v238_v0  ;;  %v229_v1 = vld [vmem:[%s308_s1] sm:$0xff]   ;;  %223 = vmatprep.mubr.msk.bf16.mxu0 %vm239_vm1, %v238_v0  ;;  %23 = vst.msk [vmem:[#allocation2] sm:$0xff] %vm22_vm0, %v238_v0  ;;  %24 = vst.msk [vmem:[#allocation2 + $0x8] sm:$0xff] %vm22_vm0, %v238_v0  ;;  %v230_v2 = vld [vmem:[%s308_s1 + $0x8] sm:$0xff]  }
   0x2   :  { %208 = vmatpush3.bf16.msra.mxu0 %v229_v1  ;;  %v231_v3 = vld [vmem:[%s308_s1 + $0x10] sm:$0xff]   ;;  %v232_v4 = vld [vmem:[%s308_s1 + $0x18] sm:$0xff]   ;;  %v233_v5 = vld [vmem:[%s308_s1 + $0x20] sm:$0xff]  }
   0x3   :  { %209 = vmatprep.subr.bf16.mxu0 %v238_v0  ;;  %v234_v6 = vld [vmem:[%s308_s1 + $0x28] sm:$0xff]   ;;  %v235_v7 = vld [vmem:[%s308_s1 + $0x30] sm:$0xff]   ;;  %v236_v8 = vld [vmem:[%s308_s1 + $0x38] sm:$0xff]  }
   0x4   :  { %v237_v9 = vld [vmem:[%s309_s0] sm:$0xff]  }
   0x5   :  { %v195_v18 = vld [vmem:[%s310_s3] sm:$0xff]  }
   0x6   :  { %210 = vmatpush3.bf16.msra.mxu0 %v230_v2  ;;  %v189_v19 = vld [vmem:[%s311_s2] ss:$0 sm:$0xff]  ;;  %v196_v20 = vunpack.c.l.bf16 %v195_v18  ;;  %v197_v23 = vunpack.c.h.bf16 %v195_v18 }
   0x7   :  { %211 = vmatprep.subr.bf16.mxu0 %v238_v0 }
   0x8   :  { %v43_v10 = vld [vmem:[#allocation2] sm:$0xff]  ;;  %v44_v12 = vld [vmem:[#allocation2 + $0x8] sm:$0xff] }
   0xa   :  { %212 = vmatpush3.bf16.msra.mxu0 %v231_v3 }
   0xb   :  { %213 = vmatprep.subr.bf16.mxu0 %v238_v0 }
   0xe   :  { %214 = vmatpush3.bf16.msra.mxu0 %v232_v4 }
   0xf   :  { %215 = vmatprep.subr.bf16.mxu0 %v238_v0 }
  0x12   :  { %216 = vmatpush3.bf16.msra.mxu0 %v233_v5 }
  0x13   :  { %217 = vmatprep.subr.bf16.mxu0 %v238_v0 }
  0x16   :  { %218 = vmatpush3.bf16.msra.mxu0 %v234_v6 }
  0x17   :  { %219 = vmatprep.subr.bf16.mxu0 %v238_v0 }
  0x1a   :  { %220 = vmatpush3.bf16.msra.mxu0 %v235_v7 }
  0x1b   :  { %221 = vmatprep.subr.bf16.mxu0 %v238_v0 }
  0x1e   :  { %222 = vmatpush3.bf16.msra.mxu0 %v236_v8 }
  0x21   :  { %224 = vmatmul.mubr.bf16.vlgmr.msra.gmra.mrb[0].mxu0 %v237_v9 }
  0xf4   :  { %v133_v11 = vpop.f32.mrb[0].mxu0 }
  0xf5   :  { %v140_v13 = vadd.f32 %v133_v11, %v43_v10  ;;  %v225_v14 = vpop.f32.mrb[1].mxu0 }
  0xf6   :  { %v136_v15 = vpop.f32.mrb[2].mxu0 }
  0xf7   :  { %143 = vst.msk [vmem:[#allocation2] sm:$0xff] %vm22_vm0, %v140_v13  ;;  %v141_v16 = vadd.f32 %v136_v15, %v44_v12  ;;  %v226_v17 = vpop.f32.mrb[3].mxu0 }
  0xf9   :  { %144 = vst.msk [vmem:[#allocation2 + $0x8] sm:$0xff] %vm22_vm0, %v141_v16 }
  0xfe   :  { %v148_v21 = vld [vmem:[#allocation2] sm:$0xff] }
  0xff   :  { %v157_v22 = vadd.f32 %v189_v19, %v148_v21 }
 0x100   :  { %v149_v24 = vld [vmem:[#allocation2 + $0x8] sm:$0xff] }
 0x101   :  { %v163_v25 = vadd.f32 %v196_v20, %v157_v22  ;;  %v158_v26 = vadd.f32 %v189_v19, %v149_v24 }
 0x103   :  { %v192_v27 = vpack.c.bf16 %v163_v25, %v163_v25  ;;  %v164_v28 = vadd.f32 %v197_v23, %v158_v26 }
 0x105   :  { %174 = vst.msk [vmem:[%s312_s4] sm:$0xf] %vm173_vm2, %v192_v27  ;;  %v193_v29 = vpack.c.bf16 %v164_v28, %v164_v28 }
 0x107   :  { %175 = vst.msk [vmem:[%s312_s4 + $0x4] sm:$0xf] %vm173_vm2, %v193_v29 }

// kernel: gpt_forward.21
= control target key start
LH: loop header
LB: loop body
LE: loop exit
PB: predicated region body
PF: predicated region fallthrough
CT: control target
= control target key end

     0   :  { %vm29_vm0 = vcmask 261120   ;;  %s402_s0 = inlined_call_operand.vmem [shape: bf16[16,32], index: 0, kind: input, shape index: {}]   ;;  %s403_s1 = inlined_call_operand.vmem [shape: bf16[128,32], index: 1, kind: input, shape index: {}]   ;;  %s404_s2 = inlined_call_operand.vmem [shape: f32[1,32], index: 2, kind: input, shape index: {}]   ;;  %s405_s3 = inlined_call_operand.vmem [shape: f32[1,32], index: 3, kind: input, shape index: {}]   ;;  %s406_s4 = inlined_call_operand.hbm [shape: f32[16,128], index: 4, kind: output, shape index: {}]  }
   0x1   :  { %v241_v0 = vld [vmem:[%s402_s0] sm:$0xff]  }
   0x2   :  { %v242_v1 = vunpack.c.l.bf16 %v241_v0  ;;  %v243_v2 = vunpack.c.h.bf16 %v241_v0 }
   0x4   :  { %v30_v3 = vsel %vm29_vm0, %v242_v1, 0.0  ;;  %v33_v4 = vsel %vm29_vm0, %v243_v2, 0.0 }
   0x5   :  { %31 = vadd.xlane.f32.xlu0 %v30_v3 }
   0x6   :  { %9 = vsyncpa [#allocation4], 0  ;;  %v278_v5 = vld [vmem:[%s403_s1] sm:$0xff]   ;;  %v314_v6 = vmov 0.0   ;;  %v279_v8 = vld [vmem:[%s403_s1 + $0x8] sm:$0xff]   ;;  %vm315_vm1 = vmmov 0  }
   0x7   :  { %253 = vmatprep.subr.bf16.mxu0 %v314_v6  ;;  %v138_v7 = vsel %vm29_vm0, %v278_v5, 0  ;;  %v141_v9 = vsel %vm29_vm0, %v279_v8, 0  ;;  %v280_v10 = vld [vmem:[%s403_s1 + $0x10] sm:$0xff]   ;;  %v281_v12 = vld [vmem:[%s403_s1 + $0x18] sm:$0xff]   ;;  %v282_v14 = vld [vmem:[%s403_s1 + $0x20] sm:$0xff]   ;;  %269 = vmatprep.mubr.msk.bf16.mxu0 %vm315_vm1, %v314_v6  ;;  %s316_s9 = smov [#allocation3]  }
   0x8   :  { %254 = vmatpush3.bf16.xpose.msra.mxu0 %v138_v7  ;;  %v144_v11 = vsel %vm29_vm0, %v280_v10, 0  ;;  %v147_v13 = vsel %vm29_vm0, %v281_v12, 0  ;;  %v150_v15 = vsel %vm29_vm0, %v282_v14, 0  ;;  %v283_v26 = vld [vmem:[%s403_s1 + $0x28] sm:$0xff]   ;;  %v284_v28 = vld [vmem:[%s403_s1 + $0x30] sm:$0xff]   ;;  %v285_v30 = vld [vmem:[%s403_s1 + $0x38] sm:$0xff]  }
   0x9   :  { %34 = vadd.xlane.f32.xlu0 %v33_v4  ;;  %255 = vmatprep.subr.bf16.mxu0 %v314_v6  ;;  %v153_v27 = vsel %vm29_vm0, %v283_v26, 0  ;;  %v156_v29 = vsel %vm29_vm0, %v284_v28, 0  ;;  %v159_v31 = vsel %vm29_vm0, %v285_v30, 0  ;;  %v229_v40 = vld [vmem:[%s404_s2] ss:$0 sm:$0xff]  ;;  %s218_s10 = sshll.u32 %s316_s9, 4  ;;  %s219_s10 = int_to_ptr.vmem [resolvable:$true] %s218_s10 }
   0xa   :  { %v230_v44 = vld [vmem:[%s405_s3] ss:$0 sm:$0xff]  ;;  %s290_s2 = scalar_lea.vmem %s219_s10, 256  ;;  %p295_p1 = scmp.lt.s32.totalorder %s219_s10, %s219_s10 }
   0xb   :  { %p291_p0 = scmp.ne.s32.totalorder %s219_s10, %s290_s2  ;;  %p296_p2 = scmp.lt.s32.totalorder %s290_s2, %s290_s2 }
   0xd   :  { %p297_p3 = por %p296_p2, %p295_p1 }
   0xf   :  { %p298_p4 = pnand %p297_p3, %p291_p0 }
  0x10   :  { %256 = vmatpush3.bf16.xpose.msra.mxu0 %v141_v9 }
  0x11   :  { %257 = vmatprep.subr.bf16.mxu0 %v314_v6 }
  0x18   :  { %258 = vmatpush3.bf16.xpose.msra.mxu0 %v144_v11 }
  0x19   :  { %259 = vmatprep.subr.bf16.mxu0 %v314_v6 }
  0x20   :  { %260 = vmatpush3.bf16.xpose.msra.mxu0 %v147_v13 }
  0x21   :  { %261 = vmatprep.subr.bf16.mxu0 %v314_v6 }
  0x28   :  { %262 = vmatpush3.bf16.xpose.msra.mxu0 %v150_v15 }
  0x29   :  { %263 = vmatprep.subr.bf16.mxu0 %v314_v6 }
  0x30   :  { %264 = vmatpush3.bf16.xpose.msra.mxu0 %v153_v27 }
  0x31   :  { %265 = vmatprep.subr.bf16.mxu0 %v314_v6 }
  0x38   :  { %266 = vmatpush3.bf16.xpose.msra.mxu0 %v156_v29 }
  0x39   :  { %267 = vmatprep.subr.bf16.mxu0 %v314_v6 }
  0x40   :  { %268 = vmatpush3.bf16.xpose.msra.mxu0 %v159_v31 }
  0x92   :  { %v32_v16 = vpop.xlane.xlu0 %31 }
  0x93   :  { %v37_v17 = vmul.f32 0.03125, %v32_v16 }
  0x95   :  { %v39_v18 = vsub.f32 %v242_v1, %v37_v17 }
  0x96   :  { %v35_v19 = vpop.xlane.xlu0 %34 }
  0x97   :  { %v38_v20 = vmul.f32 0.03125, %v35_v19  ;;  %v41_v21 = vmul.f32 %v39_v18, %v39_v18 }
  0x99   :  { %v40_v22 = vsub.f32 %v243_v2, %v38_v20  ;;  %v43_v23 = vsel %vm29_vm0, %v41_v21, 0.0 }
  0x9a   :  { %44 = vadd.xlane.f32.xlu1 %v43_v23 }
  0x9b   :  { %v42_v24 = vmul.f32 %v40_v22, %v40_v22 }
  0x9d   :  { %v46_v25 = vsel %vm29_vm0, %v42_v24, 0.0 }
  0x9e   :  { %47 = vadd.xlane.f32.xlu1 %v46_v25 }
 0x127   :  { %v45_v32 = vpop.xlane.xlu1 %44 }
 0x128   :  { %v49_v33 = vmul.f32 0.03125, %v45_v32 }
 0x12a   :  { %v51_v34 = vadd.f32 1e-05, %v49_v33 }
 0x12b   :  { %v48_v35 = vpop.xlane.xlu1 %47 }
 0x12c   :  { %286 = vrsqrt.f32 %v51_v34  ;;  %v50_v36 = vmul.f32 0.03125, %v48_v35 }
 0x12e   :  { %v52_v37 = vadd.f32 1e-05, %v50_v36 }
 0x130   :  { %288 = vrsqrt.f32 %v52_v37 }
 0x136   :  { %v287_v38 = vpop.eup %286 }
 0x137   :  { %v55_v39 = vmul.f32 %v287_v38, %v39_v18 }
 0x139   :  { %v64_v43 = vmul.f32 %v229_v40, %v55_v39 }
 0x13a   :  { %v289_v41 = vpop.eup %288 }
 0x13b   :  { %v56_v42 = vmul.f32 %v289_v41, %v40_v22  ;;  %v73_v46 = vadd.f32 %v230_v44, %v64_v43 }
 0x13d   :  { %v65_v45 = vmul.f32 %v229_v40, %v56_v42 }
 0x13f   :  { %v74_v47 = vadd.f32 %v230_v44, %v65_v45 }
 0x141   :  { %v75_v48 = vpack.c.bf16 %v74_v47, %v73_v46 }
 0x143   :  { %270 = vmatmul.mubr.msk.bf16.vlgmr.msra.gmra.mrb[0].mxu0 %vm29_vm0, %v75_v48 }
 0x216   :  { %v195_v49 = vpop.f32.mrb[0].mxu0 }
 0x217   :  { %211 = vst [vmem:[#allocation3] sm:$0xff] %v195_v49  ;;  %v271_v50 = vpop.f32.mrb[1].mxu0 }
 0x218   :  { %v198_v51 = vpop.f32.mrb[2].mxu0 }
 0x219   :  { %212 = vst [vmem:[#allocation3 + $0x8] sm:$0xff] %v198_v51  ;;  %v272_v52 = vpop.f32.mrb[3].mxu0 }
 0x21a   :  { %301 = shalt.err (!%p298_p4)
}
 0x21b   :  { %s302_s12 = scalar_lea.hbm %s406_s4, 256 }
 0x21c   :  { %p303_p5 = scmp.ne.s32.totalorder %s406_s4, %s302_s12  ;;  %p306_p6 = scmp.lt.u32.totalorder %s302_s12, %s406_s4 }
 0x21e   :  { %p308_p7 = pnand %p306_p6, %p303_p5 }
 0x220   :  { %311 = shalt.err (!%p308_p7)
}
 0x221   :  { %s317_s17 = smov 128   ;;  %s318_s18 = smov 8  }
 0x222   :  { %224 = dma.vmem_to_hbm [thread:$0]  %s219_s10, 256, %s406_s4, [#allocation4], %s317_s17, %s317_s17, %s318_s18  }
 0x223   :  { %312 = dma.done.wait [#allocation4], 256  }
 0x224   :  { %313 = vsyncadd [#allocation4], 4294967040 }
 0x225   :  { %228 = vsyncpa [#allocation4], 1 }

</bundles_post_ra>
